<compile_context>
chip_gen: v7x
topology: tpu7x:2x2x1
jax: 0.10.0
libtpu: 0.0.40
codegen_flags: <defaults>
</compile_context>

<pallas_src>
import functools

import jax
import jax.numpy as jnp
from jax import lax
from jax.experimental import pallas as pl
from jax.experimental.pallas import tpu as pltpu


def _round_up(x, m):
    return (x + m - 1) // m * m


def _leaky(v):
    return jnp.where(v >= 0.0, v, 0.2 * v)


def _res_d_kernel(xs_ref, w1_ref, w2_ref, ws_ref, bs_ref, gamma_ref,
                  out_ref, h1p_ref, *, cin, learned_shortcut):
    """Fused resD forward for one (batch, row-tile) grid step.

    xs_ref   : (1, Ho+3, Wp, 4*Cin) polyphase-packed, zero-row-extended input:
               xs[1+i, j, 2a+b] = xpad[2i+a, 2j+b]; rows 0 / Ho+2 and columns
               >= Wo+1 are zero.
    w1_ref   : (4, 4*Cin, Cout)  conv_r[0] weights, tap = 2*kh2 + kw2.
    w2_ref   : (9, Cout, Cout)   conv_r[2] weights, tap = kh*3 + kw.
    ws_ref   : (Cin, Cout)       conv_s 1x1 weight (unused for identity shortcut).
    bs_ref   : (1, Cout)         conv_s bias.
    gamma_ref: (1, 1)            residual gate.
    out_ref  : (1, TH, Wo, Cout) shortcut + gamma * residual for this row tile.
    h1p_ref  : (TH+2, Wp, Cout)  scratch: conv1 output rows [r0-1, r0+TH] with the
               conv2 zero halo at the image top/bottom and in columns >= Wo.
    """
    TH = out_ref.shape[1]
    Wo = out_ref.shape[2]
    Cout = out_ref.shape[3]
    Wp = h1p_ref.shape[1]
    f32 = jnp.float32

    t = pl.program_id(1)
    r0 = t * TH

    # ---- conv_r[0]: 4x4 / stride 2 / pad 1 (TH+2 rows incl. recomputed halo) --
    # Both kw2 taps share the same aligned slab; the +1 column shift is applied
    # to the f32 result with a sublane roll (no misaligned VMEM slices).
    X0 = xs_ref[0, pl.ds(r0, TH + 2)]          # (TH+2, Wp, 4Cin), kh2 = 0
    X1 = xs_ref[0, pl.ds(r0 + 1, TH + 2)]      # (TH+2, Wp, 4Cin), kh2 = 1
    M1 = (TH + 2) * Wp
    X0m = X0.reshape(M1, 4 * cin)              # layout-free: Wp % 8 == 0
    X1m = X1.reshape(M1, 4 * cin)

    A = (jnp.dot(X0m, w1_ref[0], preferred_element_type=f32) +
         jnp.dot(X1m, w1_ref[2], preferred_element_type=f32)
         ).reshape(TH + 2, Wp, Cout)                           # kw2 = 0 taps
    Bm = (jnp.dot(X0m, w1_ref[1], preferred_element_type=f32) +
          jnp.dot(X1m, w1_ref[3], preferred_element_type=f32)
          ).reshape(TH + 2, Wp, Cout)                          # kw2 = 1 taps
    # h1[:, j] = A[:, j] + Bm[:, j+1]  (roll by Wp-1 == shift -1)
    h1 = _leaky(A + pltpu.roll(Bm, Wp - 1, axis=1))

    # Stage into the scratch: real columns + zero the small dead-column band.
    h1p_ref[:, :Wo, :] = h1[:, :Wo, :].astype(h1p_ref.dtype)
    h1p_ref[:, Wo:, :] = jnp.zeros((TH + 2, Wp - Wo, Cout), h1p_ref.dtype)

    # conv2's zero padding at the image top / bottom (only at edge tiles).
    @pl.when(t == 0)
    def _():
        h1p_ref[0, :, :] = jnp.zeros((Wp, Cout), h1p_ref.dtype)

    @pl.when(t == pl.num_programs(1) - 1)
    def _():
        h1p_ref[TH + 1, :, :] = jnp.zeros((Wp, Cout), h1p_ref.dtype)

    # ---- conv_r[2]: 3x3 / stride 1 / pad 1 -----------------------------------
    # Group taps by kw; the +-1 column shifts are rolls of the f32 partials, and
    # the zero columns/rows of the scratch provide the boundary zeros for free.
    M2 = TH * Wp
    g = [None, None, None]
    for kh in range(3):
        Hm = h1p_ref[kh:kh + TH].reshape(M2, Cout)             # aligned major slice
        for kw in range(3):
            d = jnp.dot(Hm, w2_ref[kh * 3 + kw], preferred_element_type=f32)
            g[kw] = d if g[kw] is None else g[kw] + d
    g = [gi.reshape(TH, Wp, Cout) for gi in g]
    acc2 = (g[1] +
            pltpu.roll(g[0], 1, axis=1) +            # needs column j-1
            pltpu.roll(g[2], Wp - 1, axis=1))        # needs column j+1
    res = _leaky(acc2)

    # ---- shortcut: avg_pool2d(x, 2) (+ 1x1 conv_s only when learned) ---------
    # Reuses the already-loaded conv1 slabs; phases grouped by their column shift.
    sA = (X0[1:TH + 1, :, 3 * cin:4 * cin].astype(f32) +
          X1[1:TH + 1, :, 1 * cin:2 * cin].astype(f32))        # column j
    sB = (X0[1:TH + 1, :, 2 * cin:3 * cin].astype(f32) +
          X1[1:TH + 1, :, 0 * cin:1 * cin].astype(f32))        # column j+1
    pooled = 0.25 * (sA + pltpu.roll(sB, Wp - 1, axis=1))
    if learned_shortcut:
        sc = (jnp.dot(pooled.reshape(M2, cin).astype(ws_ref.dtype), ws_ref[...],
                      preferred_element_type=f32).reshape(TH, Wp, Cout)
              + bs_ref[...].reshape(1, 1, Cout))
    else:
        sc = pooled                                  # identity: conv_s skipped

    out = sc + gamma_ref[...].reshape(1, 1, 1) * res
    # NOTE: for Cout < 128 (test config) the HBM store is lane-sparse; real
    # DF-GAN configs have Cout >= 128 so the write-back is already lane-dense.
    out_ref[0] = out[:, :Wo, :].astype(out_ref.dtype)


def _pick_row_tile(ho, wp, cin, cout):
    """Largest divisor of Ho keeping per-tile f32 slabs (M*Cmax) ~<= 2 MiB."""
    max_m = max(wp, (2 * 1024 * 1024) // (4 * max(cin, cout, 1)))
    th = 1
    for cand in range(1, ho + 1):
        if ho % cand == 0 and cand * wp <= max_m:
            th = cand
    return th


def make_params(key, in_dim, out_dim):
    k1, k2, k3, k4 = jax.random.split(key, 4)
    return {
        # conv_r[0]: OIHW (out_dim, in_dim, 4, 4), no bias
        "w1": 0.1 * jax.random.normal(k1, (out_dim, in_dim, 4, 4), jnp.float32),
        # conv_r[2]: OIHW (out_dim, out_dim, 3, 3), no bias
        "w2": 0.1 * jax.random.normal(k2, (out_dim, out_dim, 3, 3), jnp.float32),
        # conv_s: OIHW (out_dim, in_dim, 1, 1) + bias
        "ws": 0.1 * jax.random.normal(k3, (out_dim, in_dim, 1, 1), jnp.float32),
        "bs": 0.1 * jax.random.normal(k4, (out_dim,), jnp.float32),
        # torch init is zeros(1); nonzero here so the residual branch is exercised.
        "gamma": jnp.array([0.5], jnp.float32),
    }


@functools.partial(
    jax.jit,
    static_argnames=("downsample", "compute_dtype", "out_dtype", "row_tile"))
def res_d_forward(x_nchw, params, downsample=True,
                  compute_dtype=jnp.float32, out_dtype=jnp.float32,
                  row_tile=None):
    """resD forward, NCHW in / NCHW out (like the PyTorch module).

    compute_dtype: storage / MXU-input dtype for activations + weights (bf16 is
    valid on v5e/v6e/v7x; accumulation and elementwise math stay f32).
    out_dtype: dtype of the returned activation.
    row_tile: output rows per grid step (must divide Ho); auto-chosen if None.
    """
    # The residual branch always halves H, W, so the PyTorch module only
    # shape-checks with downsample=True.
    assert downsample, "resD residual halves H,W; downsample must be True"
    cdt = compute_dtype
    x = jnp.transpose(x_nchw, (0, 2, 3, 1)).astype(cdt)   # NHWC, cast BEFORE repack
    B, H, W, Cin = x.shape
    # TODO(synk): odd H/W needs an asymmetric polyphase split (PyTorch pads/floors
    # differently there); only even spatial dims are supported here.
    assert H % 2 == 0 and W % 2 == 0, "even spatial dims required"
    Ho, Wo = H // 2, W // 2
    Cout = params["w1"].shape[0]
    learned_shortcut = Cin != Cout
    Wp = _round_up(Wo + 1, 8)           # sublane-aligned packed width

    TH = row_tile if row_tile is not None else _pick_row_tile(Ho, Wp, Cin, Cout)
    assert Ho % TH == 0, "row_tile must divide Ho"
    n_t = Ho // TH

    # Polyphase repack (pure relayout of x, done in compute dtype):
    #   xs[b, 1+i, j, (2a+bb)*Cin + c] = xpad[b, 2i+a, 2j+bb, c];
    #   rows 0 / Ho+2 and columns >= Wo+1 are zeros.
    # TODO(synk): fold this repack into the kernel (in-kernel strided phase reads)
    # to drop this extra XLA relayout pass over x.
    xpad = jnp.pad(x, ((0, 0), (1, 1), (1, 1), (0, 0)))               # (B,H+2,W+2,Cin)
    phases = (xpad.reshape(B, Ho + 1, 2, Wo + 1, 2, Cin)
                  .transpose(0, 1, 3, 2, 4, 5)
                  .reshape(B, Ho + 1, Wo + 1, 4 * Cin))
    xs = jnp.pad(phases, ((0, 0), (1, 1), (0, Wp - (Wo + 1)), (0, 0)))

    # conv_r[0] weights: per (kh2, kw2) tap, the 4 phase sub-filters stacked on K.
    w1_hwio = jnp.transpose(params["w1"], (2, 3, 1, 0))               # (4,4,Cin,Cout)
    w1f = jnp.stack([
        jnp.concatenate([w1_hwio[2 * kh2 + a, 2 * kw2 + bb]
                         for a in range(2) for bb in range(2)], axis=0)
        for kh2 in range(2) for kw2 in range(2)], axis=0).astype(cdt)  # (4,4Cin,Cout)

    # conv_r[2] weights, tap index kh*3 + kw.
    w2_hwio = jnp.transpose(params["w2"], (2, 3, 1, 0))               # (3,3,Cout,Cout)
    w2t = jnp.stack([w2_hwio[kh, kw] for kh in range(3) for kw in range(3)],
                    axis=0).astype(cdt)                               # (9,Cout,Cout)

    # conv_s (only consumed in-kernel when learned_shortcut).
    ws = jnp.transpose(params["ws"][:, :, 0, 0], (1, 0)).astype(cdt)  # (Cin, Cout)
    bs = params["bs"].reshape(1, Cout).astype(jnp.float32)
    gamma = params["gamma"].reshape(1, 1).astype(jnp.float32)

    # Chip-aware scoped-VMEM budget (v7x: 48 MiB of 64; v5e/v6e: 96 MiB of 128).
    try:
        phys_vmem = pltpu.get_tpu_info().vmem_capacity_bytes
    except Exception:
        phys_vmem = 128 * 1024 * 1024
    vmem_limit = int(min(phys_vmem * 3 // 4, 100 * 1024 * 1024))

    kernel = functools.partial(_res_d_kernel, cin=Cin,
                               learned_shortcut=learned_shortcut)

    out = pl.pallas_call(
        kernel,
        out_shape=jax.ShapeDtypeStruct((B, Ho, Wo, Cout), out_dtype),
        grid_spec=pltpu.PrefetchScalarGridSpec(
            num_scalar_prefetch=0,
            grid=(B, n_t),
            in_specs=[
                # Full padded image per batch element; constant across the row
                # axis so it is DMA'd only when b changes (stays VMEM-resident).
                pl.BlockSpec((1, Ho + 3, Wp, 4 * Cin), lambda b, t: (b, 0, 0, 0)),
                pl.BlockSpec((4, 4 * Cin, Cout), lambda b, t: (0, 0, 0)),
                pl.BlockSpec((9, Cout, Cout), lambda b, t: (0, 0, 0)),
                pl.BlockSpec((Cin, Cout), lambda b, t: (0, 0)),
                pl.BlockSpec((1, Cout), lambda b, t: (0, 0)),
                pl.BlockSpec((1, 1), lambda b, t: (0, 0)),
            ],
            out_specs=pl.BlockSpec((1, TH, Wo, Cout), lambda b, t: (b, t, 0, 0)),
            scratch_shapes=[pltpu.VMEM((TH + 2, Wp, Cout), cdt)],
        ),
        compiler_params=pltpu.CompilerParams(
            dimension_semantics=("parallel", "parallel"),
            vmem_limit_bytes=vmem_limit,
        ),
    )(xs, w1f, w2t, ws, bs, gamma)

    return jnp.transpose(out, (0, 3, 1, 2))                           # -> NCHW


def res_d_reference(x, params, downsample=True):
    """Pure-JAX/XLA reference implementing the PyTorch forward verbatim."""
    dn = ("NCHW", "OIHW", "NCHW")
    lrelu = lambda v: jnp.where(v >= 0.0, v, 0.2 * v)
    hp = lax.Precision.HIGHEST
    h = lax.conv_general_dilated(x, params["w1"], (2, 2), ((1, 1), (1, 1)),
                                 dimension_numbers=dn, precision=hp)
    h = lrelu(h)
    h = lax.conv_general_dilated(h, params["w2"], (1, 1), ((1, 1), (1, 1)),
                                 dimension_numbers=dn, precision=hp)
    res = lrelu(h)

    B, Cin, H, W = x.shape
    Cout = params["w1"].shape[0]
    if Cin != Cout:   # learned_shortcut
        s = lax.conv_general_dilated(x, params["ws"], (1, 1), ((0, 0), (0, 0)),
                                     dimension_numbers=dn, precision=hp)
        s = s + params["bs"].reshape(1, Cout, 1, 1)
    else:
        s = x
    if downsample:
        s = s.reshape(B, s.shape[1], H // 2, 2, W // 2, 2).mean(axis=(3, 5))
    return s + params["gamma"][0] * res


if __name__ == "__main__":
    key = jax.random.PRNGKey(0)
    kx, kp, kq = jax.random.split(key, 3)

    # Learned-shortcut config (Cin != Cout).
    B, Cin, Cout, H, W = 2, 4, 8, 16, 16
    x = jax.random.normal(kx, (B, Cin, H, W), jnp.float32)            # NCHW
    params = make_params(kp, Cin, Cout)

    out = jax.block_until_ready(res_d_forward(x, params))
    assert out.shape == (B, Cout, H // 2, W // 2), out.shape
    ref = res_d_reference(x, params)
    err = float(jnp.max(jnp.abs(out - ref)))
    assert err < 1e-3, f"f32 learned-shortcut: max abs err {err}"

    # Multi-row-tile path (exercises the conv1 halo recompute + edge-row zeroing).
    out_t = jax.block_until_ready(res_d_forward(x, params, row_tile=4))
    err_t = float(jnp.max(jnp.abs(out_t - ref)))
    assert err_t < 1e-3, f"row-tiled: max abs err {err_t}"

    # Identity-shortcut config (Cin == Cout): the 1x1 conv_s matmul is skipped.
    x_id = jax.random.normal(kx, (B, Cout, H, W), jnp.float32)
    params_id = make_params(kq, Cout, Cout)
    out_id = jax.block_until_ready(res_d_forward(x_id, params_id))
    err_id = float(jnp.max(jnp.abs(out_id - res_d_reference(x_id, params_id))))
    assert err_id < 1e-3, f"f32 identity-shortcut: max abs err {err_id}"

    # bf16 storage / MXU-input path (f32 accumulation + elementwise).
    out_bf = jax.block_until_ready(
        res_d_forward(x, params, compute_dtype=jnp.bfloat16))
    err_bf = float(jnp.max(jnp.abs(out_bf - ref)))
    assert err_bf < 1e-1, f"bf16: max abs err {err_bf}"

    print("KERNEL_OK")
</pallas_src>

<mosaic_0001>
module attributes {stable_mosaic.version = 11 : i64} {
  func.func @_res_d_kernel(%arg0: i32, %arg1: i32, %arg2: memref<1x11x16x16xf32, #tpu.memory_space<vmem>>, %arg3: memref<4x16x8xf32, #tpu.memory_space<vmem>>, %arg4: memref<9x8x8xf32, #tpu.memory_space<vmem>>, %arg5: memref<4x8xf32, #tpu.memory_space<vmem>>, %arg6: memref<1x8xf32, #tpu.memory_space<vmem>>, %arg7: memref<1x1xf32, #tpu.memory_space<vmem>>, %arg8: memref<1x8x8x8xf32, #tpu.memory_space<vmem>>, %arg9: memref<10x16x8xf32, #tpu.memory_space<vmem>>) attributes {dimension_semantics = [#tpu.dimension_semantics<parallel>, #tpu.dimension_semantics<parallel>], iteration_bounds = array<i64: 2, 1>, scalar_prefetch = 0 : i64, scratch_operands = 1 : i64, tpu.core_type = #tpu.core_type<tc>, window_params = [{transform_indices = @transform_0, window_bounds = array<i64: 1, 11, 16, 16>}, {pipeline_mode = #tpu.pipeline_mode<synchronous>, transform_indices = @transform_1, window_bounds = array<i64: 4, 16, 8>}, {pipeline_mode = #tpu.pipeline_mode<synchronous>, transform_indices = @transform_2, window_bounds = array<i64: 9, 8, 8>}, {pipeline_mode = #tpu.pipeline_mode<synchronous>, transform_indices = @transform_3, window_bounds = array<i64: 4, 8>}, {pipeline_mode = #tpu.pipeline_mode<synchronous>, transform_indices = @transform_4, window_bounds = array<i64: 1, 8>}, {pipeline_mode = #tpu.pipeline_mode<synchronous>, transform_indices = @transform_5, window_bounds = array<i64: 1, 1>}, {transform_indices = @transform_6, window_bounds = array<i64: 1, 8, 8, 8>}]} {
    %c8_i32 = arith.constant 8 : i32
    %0 = arith.muli %arg1, %c8_i32 : i32
    %c0 = arith.constant 0 : index
    %1 = arith.index_cast %0 : i32 to index
    %c0_0 = arith.constant 0 : index
    %c0_1 = arith.constant 0 : index
    %2 = vector.load %arg2[%c0, %1, %c0_0, %c0_1] : memref<1x11x16x16xf32, #tpu.memory_space<vmem>>, vector<1x10x16x16xf32>
    %3 = vector.shape_cast %2 : vector<1x10x16x16xf32> to vector<10x16x16xf32>
    %c1_i32 = arith.constant 1 : i32
    %4 = arith.addi %0, %c1_i32 : i32
    %c0_2 = arith.constant 0 : index
    %5 = arith.index_cast %4 : i32 to index
    %c0_3 = arith.constant 0 : index
    %c0_4 = arith.constant 0 : index
    %6 = vector.load %arg2[%c0_2, %5, %c0_3, %c0_4] : memref<1x11x16x16xf32, #tpu.memory_space<vmem>>, vector<1x10x16x16xf32>
    %7 = vector.shape_cast %6 : vector<1x10x16x16xf32> to vector<10x16x16xf32>
    %8 = vector.shape_cast %3 : vector<10x16x16xf32> to vector<160x16xf32>
    %9 = vector.shape_cast %7 : vector<10x16x16xf32> to vector<160x16xf32>
    %c0_5 = arith.constant 0 : index
    %c0_6 = arith.constant 0 : index
    %c0_7 = arith.constant 0 : index
    %10 = vector.load %arg3[%c0_5, %c0_6, %c0_7] : memref<4x16x8xf32, #tpu.memory_space<vmem>>, vector<1x16x8xf32>
    %11 = vector.shape_cast %10 : vector<1x16x8xf32> to vector<16x8xf32>
    %cst = arith.constant dense<0.000000e+00> : vector<160x8xf32>
    %12 = tpu.matmul %8, %11, %cst {dimension_numbers = #tpu.dot_dimension_numbers<[1], [0], [0], [1], [0, 0, 1, 1], [], []>} : vector<160x16xf32>, vector<16x8xf32>, vector<160x8xf32> -> vector<160x8xf32>
    %c2 = arith.constant 2 : index
    %c0_8 = arith.constant 0 : index
    %c0_9 = arith.constant 0 : index
    %13 = vector.load %arg3[%c2, %c0_8, %c0_9] : memref<4x16x8xf32, #tpu.memory_space<vmem>>, vector<1x16x8xf32>
    %14 = vector.shape_cast %13 : vector<1x16x8xf32> to vector<16x8xf32>
    %cst_10 = arith.constant dense<0.000000e+00> : vector<160x8xf32>
    %15 = tpu.matmul %9, %14, %cst_10 {dimension_numbers = #tpu.dot_dimension_numbers<[1], [0], [0], [1], [0, 0, 1, 1], [], []>} : vector<160x16xf32>, vector<16x8xf32>, vector<160x8xf32> -> vector<160x8xf32>
    %16 = arith.addf %12, %15 : vector<160x8xf32>
    %17 = vector.shape_cast %16 : vector<160x8xf32> to vector<10x16x8xf32>
    %c1 = arith.constant 1 : index
    %c0_11 = arith.constant 0 : index
    %c0_12 = arith.constant 0 : index
    %18 = vector.load %arg3[%c1, %c0_11, %c0_12] : memref<4x16x8xf32, #tpu.memory_space<vmem>>, vector<1x16x8xf32>
    %19 = vector.shape_cast %18 : vector<1x16x8xf32> to vector<16x8xf32>
    %cst_13 = arith.constant dense<0.000000e+00> : vector<160x8xf32>
    %20 = tpu.matmul %8, %19, %cst_13 {dimension_numbers = #tpu.dot_dimension_numbers<[1], [0], [0], [1], [0, 0, 1, 1], [], []>} : vector<160x16xf32>, vector<16x8xf32>, vector<160x8xf32> -> vector<160x8xf32>
    %c3 = arith.constant 3 : index
    %c0_14 = arith.constant 0 : index
    %c0_15 = arith.constant 0 : index
    %21 = vector.load %arg3[%c3, %c0_14, %c0_15] : memref<4x16x8xf32, #tpu.memory_space<vmem>>, vector<1x16x8xf32>
    %22 = vector.shape_cast %21 : vector<1x16x8xf32> to vector<16x8xf32>
    %cst_16 = arith.constant dense<0.000000e+00> : vector<160x8xf32>
    %23 = tpu.matmul %9, %22, %cst_16 {dimension_numbers = #tpu.dot_dimension_numbers<[1], [0], [0], [1], [0, 0, 1, 1], [], []>} : vector<160x16xf32>, vector<16x8xf32>, vector<160x8xf32> -> vector<160x8xf32>
    %24 = arith.addf %20, %23 : vector<160x8xf32>
    %25 = vector.shape_cast %24 : vector<160x8xf32> to vector<10x16x8xf32>
    %c15_i32 = arith.constant 15 : i32
    %26 = tpu.dynamic_rotate %25 by %c15_i32 dim 1 : vector<10x16x8xf32>, i32 -> vector<10x16x8xf32>
    %27 = arith.addf %17, %26 : vector<10x16x8xf32>
    %cst_17 = arith.constant 0.000000e+00 : f32
    %28 = vector.broadcast %cst_17 : f32 to vector<10x16x8xf32>
    %29 = arith.cmpf oge, %27, %28 : vector<10x16x8xf32>
    %cst_18 = arith.constant 2.000000e-01 : f32
    %30 = vector.broadcast %cst_18 : f32 to vector<10x16x8xf32>
    %31 = arith.mulf %30, %27 : vector<10x16x8xf32>
    %32 = arith.select %29, %27, %31 : vector<10x16x8xi1>, vector<10x16x8xf32>
    %33 = vector.extract_strided_slice %32 {offsets = [0, 0, 0], sizes = [10, 8, 8], strides = [1, 1, 1]} : vector<10x16x8xf32> to vector<10x8x8xf32>
    %c0_19 = arith.constant 0 : index
    %c0_20 = arith.constant 0 : index
    %c0_21 = arith.constant 0 : index
    %34 = vector.load %arg9[%c0_19, %c0_20, %c0_21] : memref<10x16x8xf32, #tpu.memory_space<vmem>>, vector<10x8x8xf32>
    tpu.vector_store %arg9[%c0_19, %c0_20, %c0_21], %33 {strides = array<i32>} : memref<10x16x8xf32, #tpu.memory_space<vmem>>, vector<10x8x8xf32>,
    %cst_22 = arith.constant 0.000000e+00 : f32
    %35 = vector.broadcast %cst_22 : f32 to vector<10x8x8xf32>
    %c0_23 = arith.constant 0 : index
    %c8 = arith.constant 8 : index
    %c0_24 = arith.constant 0 : index
    %36 = vector.load %arg9[%c0_23, %c8, %c0_24] : memref<10x16x8xf32, #tpu.memory_space<vmem>>, vector<10x8x8xf32>
    tpu.vector_store %arg9[%c0_23, %c8, %c0_24], %35 {strides = array<i32>} : memref<10x16x8xf32, #tpu.memory_space<vmem>>, vector<10x8x8xf32>,
    %c0_i32 = arith.constant 0 : i32
    %37 = arith.cmpi eq, %arg1, %c0_i32 : i32
    %38 = arith.extui %37 : i1 to i32
    %c0_i32_25 = arith.constant 0 : i32
    %39 = arith.cmpi ne, %38, %c0_i32_25 : i32
    scf.if %39 {
      %cst_86 = arith.constant 0.000000e+00 : f32
      %121 = vector.broadcast %cst_86 : f32 to vector<16x8xf32>
      %c0_87 = arith.constant 0 : index
      %c0_88 = arith.constant 0 : index
      %c0_89 = arith.constant 0 : index
      %122 = vector.load %arg9[%c0_87, %c0_88, %c0_89] : memref<10x16x8xf32, #tpu.memory_space<vmem>>, vector<1x16x8xf32>
      %123 = vector.shape_cast %122 : vector<1x16x8xf32> to vector<16x8xf32>
      %124 = vector.shape_cast %121 : vector<16x8xf32> to vector<1x16x8xf32>
      tpu.vector_store %arg9[%c0_87, %c0_88, %c0_89], %124 {strides = array<i32>} : memref<10x16x8xf32, #tpu.memory_space<vmem>>, vector<1x16x8xf32>,
    } else {
    }
    %c0_i32_26 = arith.constant 0 : i32
    %40 = arith.cmpi eq, %arg1, %c0_i32_26 : i32
    %41 = arith.extui %40 : i1 to i32
    %c0_i32_27 = arith.constant 0 : i32
    %42 = arith.cmpi ne, %41, %c0_i32_27 : i32
    scf.if %42 {
      %cst_86 = arith.constant 0.000000e+00 : f32
      %121 = vector.broadcast %cst_86 : f32 to vector<16x8xf32>
      %c9 = arith.constant 9 : index
      %c0_87 = arith.constant 0 : index
      %c0_88 = arith.constant 0 : index
      %122 = vector.load %arg9[%c9, %c0_87, %c0_88] : memref<10x16x8xf32, #tpu.memory_space<vmem>>, vector<1x16x8xf32>
      %123 = vector.shape_cast %122 : vector<1x16x8xf32> to vector<16x8xf32>
      %124 = vector.shape_cast %121 : vector<16x8xf32> to vector<1x16x8xf32>
      tpu.vector_store %arg9[%c9, %c0_87, %c0_88], %124 {strides = array<i32>} : memref<10x16x8xf32, #tpu.memory_space<vmem>>, vector<1x16x8xf32>,
    } else {
    }
    %c0_28 = arith.constant 0 : index
    %c0_29 = arith.constant 0 : index
    %c0_30 = arith.constant 0 : index
    %43 = vector.load %arg9[%c0_28, %c0_29, %c0_30] : memref<10x16x8xf32, #tpu.memory_space<vmem>>, vector<8x16x8xf32>
    %44 = vector.shape_cast %43 : vector<8x16x8xf32> to vector<128x8xf32>
    %c0_31 = arith.constant 0 : index
    %c0_32 = arith.constant 0 : index
    %c0_33 = arith.constant 0 : index
    %45 = vector.load %arg4[%c0_31, %c0_32, %c0_33] : memref<9x8x8xf32, #tpu.memory_space<vmem>>, vector<1x8x8xf32>
    %46 = vector.shape_cast %45 : vector<1x8x8xf32> to vector<8x8xf32>
    %cst_34 = arith.constant dense<0.000000e+00> : vector<128x8xf32>
    %47 = tpu.matmul %44, %46, %cst_34 {dimension_numbers = #tpu.dot_dimension_numbers<[1], [0], [0], [1], [0, 0, 1, 1], [], []>} : vector<128x8xf32>, vector<8x8xf32>, vector<128x8xf32> -> vector<128x8xf32>
    %c1_35 = arith.constant 1 : index
    %c0_36 = arith.constant 0 : index
    %c0_37 = arith.constant 0 : index
    %48 = vector.load %arg4[%c1_35, %c0_36, %c0_37] : memref<9x8x8xf32, #tpu.memory_space<vmem>>, vector<1x8x8xf32>
    %49 = vector.shape_cast %48 : vector<1x8x8xf32> to vector<8x8xf32>
    %cst_38 = arith.constant dense<0.000000e+00> : vector<128x8xf32>
    %50 = tpu.matmul %44, %49, %cst_38 {dimension_numbers = #tpu.dot_dimension_numbers<[1], [0], [0], [1], [0, 0, 1, 1], [], []>} : vector<128x8xf32>, vector<8x8xf32>, vector<128x8xf32> -> vector<128x8xf32>
    %c2_39 = arith.constant 2 : index
    %c0_40 = arith.constant 0 : index
    %c0_41 = arith.constant 0 : index
    %51 = vector.load %arg4[%c2_39, %c0_40, %c0_41] : memref<9x8x8xf32, #tpu.memory_space<vmem>>, vector<1x8x8xf32>
    %52 = vector.shape_cast %51 : vector<1x8x8xf32> to vector<8x8xf32>
    %cst_42 = arith.constant dense<0.000000e+00> : vector<128x8xf32>
    %53 = tpu.matmul %44, %52, %cst_42 {dimension_numbers = #tpu.dot_dimension_numbers<[1], [0], [0], [1], [0, 0, 1, 1], [], []>} : vector<128x8xf32>, vector<8x8xf32>, vector<128x8xf32> -> vector<128x8xf32>
    %c1_43 = arith.constant 1 : index
    %c0_44 = arith.constant 0 : index
    %c0_45 = arith.constant 0 : index
    %54 = vector.load %arg9[%c1_43, %c0_44, %c0_45] : memref<10x16x8xf32, #tpu.memory_space<vmem>>, vector<8x16x8xf32>
    %55 = vector.shape_cast %54 : vector<8x16x8xf32> to vector<128x8xf32>
    %c3_46 = arith.constant 3 : index
    %c0_47 = arith.constant 0 : index
    %c0_48 = arith.constant 0 : index
    %56 = vector.load %arg4[%c3_46, %c0_47, %c0_48] : memref<9x8x8xf32, #tpu.memory_space<vmem>>, vector<1x8x8xf32>
    %57 = vector.shape_cast %56 : vector<1x8x8xf32> to vector<8x8xf32>
    %cst_49 = arith.constant dense<0.000000e+00> : vector<128x8xf32>
    %58 = tpu.matmul %55, %57, %cst_49 {dimension_numbers = #tpu.dot_dimension_numbers<[1], [0], [0], [1], [0, 0, 1, 1], [], []>} : vector<128x8xf32>, vector<8x8xf32>, vector<128x8xf32> -> vector<128x8xf32>
    %59 = arith.addf %47, %58 : vector<128x8xf32>
    %c4 = arith.constant 4 : index
    %c0_50 = arith.constant 0 : index
    %c0_51 = arith.constant 0 : index
    %60 = vector.load %arg4[%c4, %c0_50, %c0_51] : memref<9x8x8xf32, #tpu.memory_space<vmem>>, vector<1x8x8xf32>
    %61 = vector.shape_cast %60 : vector<1x8x8xf32> to vector<8x8xf32>
    %cst_52 = arith.constant dense<0.000000e+00> : vector<128x8xf32>
    %62 = tpu.matmul %55, %61, %cst_52 {dimension_numbers = #tpu.dot_dimension_numbers<[1], [0], [0], [1], [0, 0, 1, 1], [], []>} : vector<128x8xf32>, vector<8x8xf32>, vector<128x8xf32> -> vector<128x8xf32>
    %63 = arith.addf %50, %62 : vector<128x8xf32>
    %c5 = arith.constant 5 : index
    %c0_53 = arith.constant 0 : index
    %c0_54 = arith.constant 0 : index
    %64 = vector.load %arg4[%c5, %c0_53, %c0_54] : memref<9x8x8xf32, #tpu.memory_space<vmem>>, vector<1x8x8xf32>
    %65 = vector.shape_cast %64 : vector<1x8x8xf32> to vector<8x8xf32>
    %cst_55 = arith.constant dense<0.000000e+00> : vector<128x8xf32>
    %66 = tpu.matmul %55, %65, %cst_55 {dimension_numbers = #tpu.dot_dimension_numbers<[1], [0], [0], [1], [0, 0, 1, 1], [], []>} : vector<128x8xf32>, vector<8x8xf32>, vector<128x8xf32> -> vector<128x8xf32>
    %67 = arith.addf %53, %66 : vector<128x8xf32>
    %c2_56 = arith.constant 2 : index
    %c0_57 = arith.constant 0 : index
    %c0_58 = arith.constant 0 : index
    %68 = vector.load %arg9[%c2_56, %c0_57, %c0_58] : memref<10x16x8xf32, #tpu.memory_space<vmem>>, vector<8x16x8xf32>
    %69 = vector.shape_cast %68 : vector<8x16x8xf32> to vector<128x8xf32>
    %c6 = arith.constant 6 : index
    %c0_59 = arith.constant 0 : index
    %c0_60 = arith.constant 0 : index
    %70 = vector.load %arg4[%c6, %c0_59, %c0_60] : memref<9x8x8xf32, #tpu.memory_space<vmem>>, vector<1x8x8xf32>
    %71 = vector.shape_cast %70 : vector<1x8x8xf32> to vector<8x8xf32>
    %cst_61 = arith.constant dense<0.000000e+00> : vector<128x8xf32>
    %72 = tpu.matmul %69, %71, %cst_61 {dimension_numbers = #tpu.dot_dimension_numbers<[1], [0], [0], [1], [0, 0, 1, 1], [], []>} : vector<128x8xf32>, vector<8x8xf32>, vector<128x8xf32> -> vector<128x8xf32>
    %73 = arith.addf %59, %72 : vector<128x8xf32>
    %c7 = arith.constant 7 : index
    %c0_62 = arith.constant 0 : index
    %c0_63 = arith.constant 0 : index
    %74 = vector.load %arg4[%c7, %c0_62, %c0_63] : memref<9x8x8xf32, #tpu.memory_space<vmem>>, vector<1x8x8xf32>
    %75 = vector.shape_cast %74 : vector<1x8x8xf32> to vector<8x8xf32>
    %cst_64 = arith.constant dense<0.000000e+00> : vector<128x8xf32>
    %76 = tpu.matmul %69, %75, %cst_64 {dimension_numbers = #tpu.dot_dimension_numbers<[1], [0], [0], [1], [0, 0, 1, 1], [], []>} : vector<128x8xf32>, vector<8x8xf32>, vector<128x8xf32> -> vector<128x8xf32>
    %77 = arith.addf %63, %76 : vector<128x8xf32>
    %c8_65 = arith.constant 8 : index
    %c0_66 = arith.constant 0 : index
    %c0_67 = arith.constant 0 : index
    %78 = vector.load %arg4[%c8_65, %c0_66, %c0_67] : memref<9x8x8xf32, #tpu.memory_space<vmem>>, vector<1x8x8xf32>
    %79 = vector.shape_cast %78 : vector<1x8x8xf32> to vector<8x8xf32>
    %cst_68 = arith.constant dense<0.000000e+00> : vector<128x8xf32>
    %80 = tpu.matmul %69, %79, %cst_68 {dimension_numbers = #tpu.dot_dimension_numbers<[1], [0], [0], [1], [0, 0, 1, 1], [], []>} : vector<128x8xf32>, vector<8x8xf32>, vector<128x8xf32> -> vector<128x8xf32>
    %81 = arith.addf %67, %80 : vector<128x8xf32>
    %82 = vector.shape_cast %73 : vector<128x8xf32> to vector<8x16x8xf32>
    %83 = vector.shape_cast %77 : vector<128x8xf32> to vector<8x16x8xf32>
    %84 = vector.shape_cast %81 : vector<128x8xf32> to vector<8x16x8xf32>
    %c1_i32_69 = arith.constant 1 : i32
    %85 = tpu.dynamic_rotate %82 by %c1_i32_69 dim 1 : vector<8x16x8xf32>, i32 -> vector<8x16x8xf32>
    %86 = arith.addf %83, %85 : vector<8x16x8xf32>
    %c15_i32_70 = arith.constant 15 : i32
    %87 = tpu.dynamic_rotate %84 by %c15_i32_70 dim 1 : vector<8x16x8xf32>, i32 -> vector<8x16x8xf32>
    %88 = arith.addf %86, %87 : vector<8x16x8xf32>
    %cst_71 = arith.constant 0.000000e+00 : f32
    %89 = vector.broadcast %cst_71 : f32 to vector<8x16x8xf32>
    %90 = arith.cmpf oge, %88, %89 : vector<8x16x8xf32>
    %cst_72 = arith.constant 2.000000e-01 : f32
    %91 = vector.broadcast %cst_72 : f32 to vector<8x16x8xf32>
    %92 = arith.mulf %91, %88 : vector<8x16x8xf32>
    %93 = arith.select %90, %88, %92 : vector<8x16x8xi1>, vector<8x16x8xf32>
    %94 = vector.extract_strided_slice %3 {offsets = [1, 0, 12], sizes = [8, 16, 4], strides = [1, 1, 1]} : vector<10x16x16xf32> to vector<8x16x4xf32>
    %95 = vector.extract_strided_slice %7 {offsets = [1, 0, 4], sizes = [8, 16, 4], strides = [1, 1, 1]} : vector<10x16x16xf32> to vector<8x16x4xf32>
    %96 = arith.addf %94, %95 : vector<8x16x4xf32>
    %97 = vector.extract_strided_slice %3 {offsets = [1, 0, 8], sizes = [8, 16, 4], strides = [1, 1, 1]} : vector<10x16x16xf32> to vector<8x16x4xf32>
    %98 = vector.extract_strided_slice %7 {offsets = [1, 0, 0], sizes = [8, 16, 4], strides = [1, 1, 1]} : vector<10x16x16xf32> to vector<8x16x4xf32>
    %99 = arith.addf %97, %98 : vector<8x16x4xf32>
    %c15_i32_73 = arith.constant 15 : i32
    %100 = tpu.dynamic_rotate %99 by %c15_i32_73 dim 1 : vector<8x16x4xf32>, i32 -> vector<8x16x4xf32>
    %101 = arith.addf %96, %100 : vector<8x16x4xf32>
    %cst_74 = arith.constant 2.500000e-01 : f32
    %102 = vector.broadcast %cst_74 : f32 to vector<8x16x4xf32>
    %103 = arith.mulf %102, %101 : vector<8x16x4xf32>
    %104 = vector.shape_cast %103 : vector<8x16x4xf32> to vector<128x4xf32>
    %c0_75 = arith.constant 0 : index
    %c0_76 = arith.constant 0 : index
    %105 = vector.load %arg5[%c0_75, %c0_76] : memref<4x8xf32, #tpu.memory_space<vmem>>, vector<4x8xf32>
    %cst_77 = arith.constant dense<0.000000e+00> : vector<128x8xf32>
    %106 = tpu.matmul %104, %105, %cst_77 {dimension_numbers = #tpu.dot_dimension_numbers<[1], [0], [0], [1], [0, 0, 1, 1], [], []>} : vector<128x4xf32>, vector<4x8xf32>, vector<128x8xf32> -> vector<128x8xf32>
    %107 = vector.shape_cast %106 : vector<128x8xf32> to vector<8x16x8xf32>
    %c0_78 = arith.constant 0 : index
    %c0_79 = arith.constant 0 : index
    %108 = vector.load %arg6[%c0_78, %c0_79] : memref<1x8xf32, #tpu.memory_space<vmem>>, vector<1x8xf32>
    %109 = vector.shape_cast %108 : vector<1x8xf32> to vector<1x1x8xf32>
    %110 = vector.broadcast %109 : vector<1x1x8xf32> to vector<8x16x8xf32>
    %111 = arith.addf %107, %110 : vector<8x16x8xf32>
    %c0_80 = arith.constant 0 : index
    %c0_81 = arith.constant 0 : index
    %112 = vector.load %arg7[%c0_80, %c0_81] : memref<1x1xf32, #tpu.memory_space<vmem>>, vector<1x1xf32>
    %113 = vector.shape_cast %112 : vector<1x1xf32> to vector<1x1x1xf32>
    %114 = vector.broadcast %113 : vector<1x1x1xf32> to vector<8x16x8xf32>
    %115 = arith.mulf %114, %93 : vector<8x16x8xf32>
    %116 = arith.addf %111, %115 : vector<8x16x8xf32>
    %117 = vector.extract_strided_slice %116 {offsets = [0, 0, 0], sizes = [8, 8, 8], strides = [1, 1, 1]} : vector<8x16x8xf32> to vector<8x8x8xf32>
    %c0_82 = arith.constant 0 : index
    %c0_83 = arith.constant 0 : index
    %c0_84 = arith.constant 0 : index
    %c0_85 = arith.constant 0 : index
    %118 = vector.load %arg8[%c0_82, %c0_83, %c0_84, %c0_85] : memref<1x8x8x8xf32, #tpu.memory_space<vmem>>, vector<1x8x8x8xf32>
    %119 = vector.shape_cast %118 : vector<1x8x8x8xf32> to vector<8x8x8xf32>
    %120 = vector.shape_cast %117 : vector<8x8x8xf32> to vector<1x8x8x8xf32>
    tpu.vector_store %arg8[%c0_82, %c0_83, %c0_84, %c0_85], %120 {strides = array<i32>} : memref<1x8x8x8xf32, #tpu.memory_space<vmem>>, vector<1x8x8x8xf32>,
    return
  }
  func.func @transform_0(%arg0: i32, %arg1: i32) -> (i32, i32, i32, i32) {
    %c0_i32 = arith.constant 0 : i32
    %c0_i32_0 = arith.constant 0 : i32
    %c0_i32_1 = arith.constant 0 : i32
    %c0_i32_2 = arith.constant 0 : i32
    return %arg0, %c0_i32, %c0_i32_0, %c0_i32_1 : i32, i32, i32, i32
  }
  func.func @transform_1(%arg0: i32, %arg1: i32) -> (i32, i32, i32) {
    %c0_i32 = arith.constant 0 : i32
    %c0_i32_0 = arith.constant 0 : i32
    %c0_i32_1 = arith.constant 0 : i32
    %c0_i32_2 = arith.constant 0 : i32
    return %c0_i32, %c0_i32_0, %c0_i32_1 : i32, i32, i32
  }
  func.func @transform_2(%arg0: i32, %arg1: i32) -> (i32, i32, i32) {
    %c0_i32 = arith.constant 0 : i32
    %c0_i32_0 = arith.constant 0 : i32
    %c0_i32_1 = arith.constant 0 : i32
    %c0_i32_2 = arith.constant 0 : i32
    return %c0_i32, %c0_i32_0, %c0_i32_1 : i32, i32, i32
  }
  func.func @transform_3(%arg0: i32, %arg1: i32) -> (i32, i32) {
    %c0_i32 = arith.constant 0 : i32
    %c0_i32_0 = arith.constant 0 : i32
    %c0_i32_1 = arith.constant 0 : i32
    return %c0_i32, %c0_i32_0 : i32, i32
  }
  func.func @transform_4(%arg0: i32, %arg1: i32) -> (i32, i32) {
    %c0_i32 = arith.constant 0 : i32
    %c0_i32_0 = arith.constant 0 : i32
    %c0_i32_1 = arith.constant 0 : i32
    return %c0_i32, %c0_i32_0 : i32, i32
  }
  func.func @transform_5(%arg0: i32, %arg1: i32) -> (i32, i32) {
    %c0_i32 = arith.constant 0 : i32
    %c0_i32_0 = arith.constant 0 : i32
    %c0_i32_1 = arith.constant 0 : i32
    return %c0_i32, %c0_i32_0 : i32, i32
  }
  func.func @transform_6(%arg0: i32, %arg1: i32) -> (i32, i32, i32, i32) {
    %c0_i32 = arith.constant 0 : i32
    %c0_i32_0 = arith.constant 0 : i32
    %c0_i32_1 = arith.constant 0 : i32
    return %arg0, %arg1, %c0_i32, %c0_i32_0 : i32, i32, i32, i32
  }
}

</mosaic_0001>

<bundles_post_ra>
// kernel: res_d_forward.1
= control target key start
LH: loop header
LB: loop body
LE: loop exit
PB: predicated region body
PF: predicated region fallthrough
CT: control target
= control target key end

     0   :  { %s6282_s0 = inlined_call_operand.hbm [shape: f32[2,11,16,16], index: 0, kind: input, shape index: {}]   ;;  %s6283_s1 = inlined_call_operand.hbm [shape: f32[4,16,8], index: 1, kind: input, shape index: {}]   ;;  %s6284_s2 = inlined_call_operand.hbm [shape: f32[9,8,8], index: 2, kind: input, shape index: {}]   ;;  %s6285_s3 = inlined_call_operand.hbm [shape: f32[4,8], index: 3, kind: input, shape index: {}]   ;;  %s6286_s4 = inlined_call_operand.hbm [shape: f32[1,8], index: 4, kind: input, shape index: {}]   ;;  %s6287_s5 = inlined_call_operand.<no memory space> [shape: f32[1,1], index: 5, kind: input, shape index: {}]   ;;  %s6288_s6 = inlined_call_operand.hbm [shape: f32[2,8,8,8], index: 6, kind: output, shape index: {}]  }
   0x1   :  { %v11_v0 = vstv %s6287_s5 }
   0x2   :  { %12 = vst [vmem:[#allocation3] sm:$0x1] %v11_v0 }
   0x3   :  { %13 = vsyncpa [#allocation5], 0 }
   0x4   :  { %15 = vsyncpa [#allocation5 + $0x1], 0 }
   0x5   :  { %16 = vsyncpa [#allocation8], 0 }
   0x6   :  { %17 = vsyncpa [#allocation11], 0 }
   0x7   :  { %18 = vsyncpa [#allocation6], 0 }
   0x8   :  { %20 = vsyncpa [#allocation6 + $0x1], 0  ;;  %s4998_s23 = smov 0   ;;  %s5000_s24 = smov 0  }
   0x9   :  { %s5002_s25 = smov 0   ;;  %s5004_s26 = smov 0  }
   0xa   :  { %s5006_s27 = smov 0   ;;  %s5008_s28 = smov 0  }
   0xb LB: > { %6295 = sst [smem:[#allocation18_spill]] %s4923_s23  ;;  %s3555_s5 = sadd.s32 4294967295, %s4943_s28   ;;  %s4943_s28 = sphi %s5008_s28, %s26_s28   ;;  %s4939_s27 = sphi %s5006_s27, %s6318_s27   ;;  %s4935_s26 = sphi %s5004_s26, %s6317_s26   ;;  %s4931_s25 = sphi %s5002_s25, %s6316_s25   ;;  %s4927_s24 = sphi %s5000_s24, %s6315_s24   ;;  %s4923_s23 = sphi %s4998_s23, %s6314_s23  }
   0xc   : > { %s3556_s29 = sadd.s32 4294967294, %s4943_s28   ;;  %p58_p0 = scmp.ne.s32.totalorder %s4927_s24, %s4923_s23 }
   0xd   : > { %p5032_p1 = scmp.eq.s32.totalorder %s3555_s5, 0  ;;  %p5036_p2 = scmp.eq.s32.totalorder %s3555_s5, 1 }
   0xe   : > { %p195_p3 = scmp.eq.s32.totalorder %s3556_s29, 1  ;;  %p3557_p5 = scmp.ge.s32.totalorder %s4943_s28, 1 }
   0xf   : > { %s6296_s30 = scalar_select %p5032_p1, 1, 0 }
  0x10   : > { %s6297_s7 = scalar_select %p5036_p2, 1, 0 }
  0x11   : > { %p5042_p4 = por %p5032_p1, %p58_p0  ;;  %p5047_p6 = por %p195_p3, %p58_p0 }
  0x12   : > { %p202_p7 = scmp.lt.s32.totalorder %s4943_s28, 3  ;;  %s4945_s11 = smov [#allocation7]  }
  0x13   : > { %s6298_s8 = scalar_select %p5042_p4, 1, 0 }
  0x14   : > { %s6299_s9 = scalar_select %p5047_p6, 1, 0 }
  0x15   : > { %p5052_p8 = pnand %p3557_p5, %p202_p7  ;;  %s214_s12 = sshll.u32 %s4945_s11, 4  ;;  %s5056_s12 = int_to_ptr.vmem [resolvable:$true] %s214_s12 }
  0x16   : > { %6300 = sst [smem:[#allocation19_spill]] %s6299_s9  ;;  %s4946_s14 = smov [#allocation10]  }
  0x17   : > { %s6301_s10 = scalar_select %p5052_p8, 1, 0 }
  0x18   : > { %p4618_p9 = pneg %p5052_p8  ;;  %s241_s15 = sshll.u32 %s4946_s14, 4  ;;  %s5067_s15 = int_to_ptr.vmem [resolvable:$true] %s241_s15 }
  0x19   : > { %s4947_s16 = smov [#allocation9]   ;;  %s4711_s20 = scalar_lea.hbm %s6283_s1, 1024 }
  0x1a   : > { %p5063_p11 = pnand %p4618_p9, %p5032_p1  ;;  %s5069_s17 = sshll.u32 %s4947_s16, 4  ;;  %s228_s17 = int_to_ptr.vmem [resolvable:$true] %s5069_s17 }
  0x1b   : > { %p4712_p12 = scmp.ne.s32.totalorder %s6283_s1, %s4711_s20  ;;  %p4718_p5 = scmp.lt.u32.totalorder %s4711_s20, %s6283_s1 }
  0x1c   : > { %p5079_p13 = pneg %p5063_p11 }
  0x1e   : > { %p4714_p0 = pnand %p5079_p13, %p4712_p12 }
  0x20   : > { %p4715_p3 = pneg %p4714_p0 }
  0x22   : > { %p4720_p7 = pnand %p4718_p5, %p4715_p3 }
  0x24   : > { %4723 = shalt.err (!%p4720_p7)
}
  0x25   : > { %s4724_s14 = scalar_lea.vmem %s5056_s12, 1024  ;;  %p4732_p1 = scmp.lt.s32.totalorder %s5056_s12, %s5056_s12 }
  0x26   : > { %p4725_p9 = scmp.ne.s32.totalorder %s5056_s12, %s4724_s14  ;;  %p4733_p4 = scmp.lt.s32.totalorder %s4724_s14, %s4724_s14 }
  0x28   : > { %p4727_p10 = pnand %p4725_p9, %p5079_p13  ;;  %p4734_p12 = por %p4733_p4, %p4732_p1 }
  0x2a   : > { %p4728_p6 = pneg %p4727_p10 }
  0x2c   : > { %p4735_p0 = pnand %p4734_p12, %p4728_p6 }
  0x2e   : > { %4738 = shalt.err (!%p4735_p0)
}
  0x2f   : > { %s4948_s16 = smov 128   ;;  %s4949_s18 = smov 8  }
  0x30   : > { %4621 = dma.hbm_to_vmem [thread:$0]  (!%p5063_p11), %s6283_s1, 1024, %s5056_s12, [#allocation8], %s4948_s16, %s4948_s16, %s4949_s18  }
  0x31   : > { %s4739_s29 = scalar_lea.hbm %s6285_s3, 64 }
  0x32   : > { %p4740_p1 = scmp.ne.s32.totalorder %s6285_s3, %s4739_s29  ;;  %p4746_p10 = scmp.lt.u32.totalorder %s4739_s29, %s6285_s3 }
  0x34   : > { %p4742_p4 = pnand %p4740_p1, %p5079_p13 }
  0x36   : > { %p4743_p6 = pneg %p4742_p4 }
  0x38   : > { %p4748_p3 = pnand %p4746_p10, %p4743_p6 }
  0x3a   : > { %4751 = shalt.err (!%p4748_p3)
}
  0x3b   : > { %s4752_s12 = scalar_lea.vmem %s5067_s15, 64  ;;  %p4760_p12 = scmp.lt.s32.totalorder %s5067_s15, %s5067_s15 }
  0x3c   : > { %p4753_p5 = scmp.ne.s32.totalorder %s5067_s15, %s4752_s12  ;;  %p4761_p0 = scmp.lt.s32.totalorder %s4752_s12, %s4752_s12 }
  0x3e   : > { %p4755_p7 = pnand %p4753_p5, %p5079_p13  ;;  %p4762_p1 = por %p4761_p0, %p4760_p12 }
  0x40   : > { %p4756_p9 = pneg %p4755_p7 }
  0x42   : > { %p4763_p4 = pnand %p4762_p1, %p4756_p9 }
  0x44   : > { %4766 = shalt.err (!%p4763_p4)
}
  0x45   : > { %4627 = dma.hbm_to_vmem [thread:$0]  (!%p5063_p11), %s6285_s3, 64, %s5067_s15, [#allocation11]  }
  0x46   : > { %s4767_s21 = scalar_lea.hbm %s6284_s2, 1152 }
  0x47   : > { %p4768_p6 = scmp.ne.s32.totalorder %s6284_s2, %s4767_s21  ;;  %p4774_p5 = scmp.lt.u32.totalorder %s4767_s21, %s6284_s2 }
  0x49   : > { %p4770_p10 = pnand %p4768_p6, %p5079_p13 }
  0x4b   : > { %p4771_p3 = pneg %p4770_p10 }
  0x4d   : > { %p4776_p7 = pnand %p4774_p5, %p4771_p3 }
  0x4f   : > { %4779 = shalt.err (!%p4776_p7)
}
  0x50   : > { %s4780_s12 = scalar_lea.vmem %s228_s17, 1152  ;;  %p4788_p1 = scmp.lt.s32.totalorder %s228_s17, %s228_s17 }
  0x51   : > { %p4781_p9 = scmp.ne.s32.totalorder %s228_s17, %s4780_s12  ;;  %p4789_p4 = scmp.lt.s32.totalorder %s4780_s12, %s4780_s12 }
  0x53   : > { %p4783_p12 = pnand %p4781_p9, %p5079_p13  ;;  %p4790_p8 = por %p4789_p4, %p4788_p1 }
  0x55   : > { %p4784_p0 = pneg %p4783_p12 }
  0x57   : > { %p4791_p2 = pnand %p4790_p8, %p4784_p0 }
  0x59   : > { %4794 = shalt.err (!%p4791_p2)
}
  0x5a   : > { %4624 = dma.hbm_to_vmem [thread:$0]  (!%p5063_p11), %s6284_s2, 1152, %s228_s17, [#allocation8], %s4948_s16, %s4948_s16, %s4949_s18  }
  0x5b   : > { %s4950_s9 = smov [#allocation12]   ;;  %s4795_s22 = scalar_lea.hbm %s6286_s4, 16 }
  0x5c   : > { %s252_s19 = sshll.u32 %s4950_s9, 4  ;;  %p4796_p2 = scmp.ne.s32.totalorder %s6286_s4, %s4795_s22  ;;  %s253_s19 = int_to_ptr.vmem [resolvable:$true] %s252_s19 }
  0x5d   : > { %p4802_p10 = scmp.lt.u32.totalorder %s4795_s22, %s6286_s4 }
  0x5e   : > { %p4798_p8 = pnand %p4796_p2, %p5079_p13 }
  0x60   : > { %p4799_p6 = pneg %p4798_p8 }
  0x62   : > { %p4804_p3 = pnand %p4802_p10, %p4799_p6 }
  0x64   : > { %4807 = shalt.err (!%p4804_p3)
}
  0x65   : > { %s4808_s17 = scalar_lea.vmem %s253_s19, 16  ;;  %s4815_s15 = scalar_lea.vmem %s253_s19, 32 }
  0x66   : > { %p4809_p5 = scmp.ne.s32.totalorder %s253_s19, %s4808_s17  ;;  %p4816_p12 = scmp.lt.s32.totalorder %s253_s19, %s253_s19 }
  0x67   : > { %p4817_p0 = scmp.lt.s32.totalorder %s4815_s15, %s4808_s17 }
  0x68   : > { %p4811_p7 = pnand %p4809_p5, %p5079_p13 }
  0x69   : > { %p4818_p1 = por %p4817_p0, %p4816_p12 }
  0x6a   : > { %p4812_p9 = pneg %p4811_p7 }
  0x6c   : > { %p4819_p4 = pnand %p4818_p1, %p4812_p9 }
  0x6e   : > { %4822 = shalt.err (!%p4819_p4)
}
  0x6f   : > { %4630 = dma.hbm_to_vmem [thread:$0]  (!%p5063_p11), %s6286_s4, 16, %s253_s19, [#allocation11]  }
  0x70   : > { %s38_s5 = sadd.s32 1, %s4939_s27  ;;  %s45_s20 = sadd.s32 1, %s4931_s25 }
  0x71   : > { %p40_p13 = scmp.ge.s32.totalorder %s38_s5, 2  ;;  %p52_p2 = scmp.ne.s32.totalorder %s4931_s25, %s4927_s24 }
  0x72   : > { %p53_p8 = scmp.eq.s32.totalorder %s4943_s28, 0  ;;  %p4643_p6 = scmp.lt.s32.totalorder %s4943_s28, 2 }
  0x73   : > { %s6320_s5 = smov (%p40_p13, %s38_s5), 0  ;;  %p6304_p3 = scmp.ne.s32.totalorder %s6297_s7, 0 }
  0x74   : > { %p54_p10 = por %p53_p8, %p52_p2  ;;  %s42_s21 = ssub.s32 %s4939_s27, %s6320_s5 }
  0x75   : > { %p5176_p5 = por %p6304_p3, %p52_p2  ;;  %s266_s22 = sand.u32 1, %s4931_s25  }
  0x76   : > { %p43_p7 = scmp.eq.s32.totalorder %s42_s21, 0  ;;  %s4595_s19 = smul.u32 176, %s266_s22 }
  0x77   : > { %p5183_p11 = pnand %p4643_p6, %p54_p10  ;;  %s4596_s14 = smul.u32 2816, %s4939_s27 }
  0x78   : > { %s5188_s11 = scalar_select %p43_p7, %s4931_s25, %s45_s20  }
  0x79   : > { %s270_s12 = scalar_lea.vmem [#allocation4], %s4595_s19  ;;  %s5194_s23 = scalar_lea.hbm %s6282_s0, %s4596_s14 }
  0x7a   : > { %s277_s17 = sshll.u32 %s270_s12, 4  ;;  %s5198_s9 = scalar_lea.sflag [#allocation5], %s266_s22  ;;  %s5196_s17 = int_to_ptr.vmem [resolvable:$true] %s277_s17 }
  0x7b   : > { %s4823_s21 = scalar_lea.hbm %s5194_s23, 2816  ;;  %p4825_p12 = pneg %p5183_p11 }
  0x7c   : > { %p4824_p9 = scmp.ne.s32.totalorder %s5194_s23, %s4823_s21  ;;  %s4828_s14 = scalar_lea.hbm %s6282_s0, 5632 }
  0x7d   : > { %p4829_p4 = scmp.lt.u32.totalorder %s5194_s23, %s6282_s0  ;;  %p4830_p13 = scmp.lt.u32.totalorder %s4828_s14, %s4823_s21 }
  0x7e   : > { %p4826_p0 = pnand %p4825_p12, %p4824_p9  ;;  %p4832_p8 = scmp.lt.u32.totalorder %s4823_s21, %s5194_s23 }
  0x7f   : > { %p4831_p2 = por %p4830_p13, %p4829_p4 }
  0x80   : > { %p4827_p1 = pneg %p4826_p0 }
  0x81   : > { %p4833_p6 = por %p4832_p8, %p4831_p2 }
  0x83   : > { %p4834_p10 = pnand %p4833_p6, %p4827_p1 }
  0x85   : > { %4837 = shalt.err (!%p4834_p10)
}
  0x86   : > { %s4838_s22 = scalar_lea.vmem %s5196_s17, 2816  ;;  %s4951_s15 = smov [#allocation4]  }
  0x87   : > { %p4839_p3 = scmp.ne.s32.totalorder %s5196_s17, %s4838_s22  ;;  %s4843_s20 = sshll.u32 %s4951_s15, 4  ;;  %s4844_s20 = int_to_ptr.vmem [resolvable:$false] %s4843_s20 }
  0x88   : > { %s4845_s19 = scalar_lea.vmem %s4844_s20, 5632  ;;  %p4846_p0 = scmp.lt.s32.totalorder %s5196_s17, %s4844_s20 }
  0x89   : > { %p4841_p7 = pnand %p4839_p3, %p4825_p12  ;;  %p4847_p4 = scmp.lt.s32.totalorder %s4845_s19, %s4838_s22 }
  0x8b   : > { %p4842_p9 = pneg %p4841_p7  ;;  %p4848_p13 = por %p4847_p4, %p4846_p0 }
  0x8d   : > { %p4849_p2 = pnand %p4848_p13, %p4842_p9 }
  0x8f   : > { %4852 = shalt.err (!%p4849_p2)
}
  0x90   : > { %4634 = dma.hbm_to_vmem [thread:$0]  (!%p5183_p11), %s5194_s23, 2816, %s5196_s17, %s5198_s9, %s4948_s16, %s4948_s16, %s4949_s18  }
  0x91   : > { %p6307_p12 = scmp.ne.s32.totalorder %s6301_s10, 0 }
  0x92   : > { %s5232_s21 = sand.u32 (!%p6307_p12), 1, %s4927_s24   ;;  %p6308_p1 = scmp.ne.s32.totalorder (!%p6307_p12), %s6298_s8, 0 }
  0x93   : > { %289 = sbr.rel (%p6307_p12) target bundleno = 968 (0x3c8), region = 44  ;;  %s292_s12 = scalar_lea.sflag (!%p6307_p12), [#allocation5], %s5232_s21 }
  0x94   : > { %s4597_s14 = smul.u32 (!%p6307_p12), 176, %s5232_s21 }
  0x96   : > { %s5236_s7 = scalar_lea.vmem (!%p6307_p12), [#allocation4], %s4597_s14 }
  0x9a   : > { %4906 = dma.done.wait (%p6308_p1), %s292_s12, 2816  }
  0x9b   : > { %4908 = vsyncadd (%p6308_p1), %s292_s12, 4294964480  ;;  %p6309_p11 = scmp.ne.s32.totalorder %s6296_s30, 0 }
  0x9d   : > { %4910 = dma.done.wait (%p6309_p11), [#allocation8], 2176  }
  0x9e   : > { %4912 = vsyncadd (%p6309_p11), [#allocation8], 4294965120 }
  0x9f   : > { %4914 = dma.done.wait (%p6309_p11), [#allocation11], 80  }
  0xa0   : > { %4916 = vsyncadd (%p6309_p11), [#allocation11], 4294967216  ;;  %vm392_vm0 = vcmask 130048   ;;  %v5251_v1 = vld [vmem:[%s5236_s7 + $0x20] sm:$0xff]  ;;  %v391_v3 = vld [vmem:[#allocation7 + $0x28] sm:$0xff]  ;;  %s4952_s8 = smov 8  }
  0xa1   : > { %v390_v2 = vld [vmem:[#allocation7 + $0x20] sm:$0xff]  ;;  %2883 = vrot.lane.b32.xlu0 %v5251_v1, %s4952_s8  ;;  %v5264_v7 = vld [vmem:[%s5236_s7 + $0x28] sm:$0xff]  ;;  %v5269_v11 = vld [vmem:[%s5236_s7 + $0x38] sm:$0xff]  ;;  %s4953_s30 = smov 120   ;;  %vm1232_vm1 = vcmask 64512   ;;  %s4955_s10 = smov 12  }
  0xa2   : > { %v4493_v4 = vpack.c.bf16 %v391_v3, %v390_v2  ;;  %v5256_v5 = vld [vmem:[%s5236_s7 + $0x30] sm:$0xff]  ;;  %v388_v9 = vld [vmem:[#allocation7 + $0x8] sm:$0xff]  ;;  %v5279_v13 = vld [vmem:[%s5236_s7 + $0x40] sm:$0xff]  ;;  %v4954_v3 = vmov 0.0   ;;  %vm3221_vm8 = vcmask 1043456   ;;  %s4956_s16 = smov 116  }
  0xa3   : > { %v5259_v6 = vld [vmem:[%s5236_s7 + $0x10] sm:$0xff]  ;;  %2887 = vrot.lane.b32.xlu1 %v5256_v5, %s4952_s8  ;;  %v5272_v12 = vld [vmem:[%s5236_s7 + $0x18] sm:$0xff]  ;;  %v5284_v14 = vld [vmem:[%s5236_s7 + $0x48] sm:$0xff]  ;;  %1243 = vst.msk [vmem:[#allocation2 + $0x8] sm:$0xff] %vm1232_vm1, %v4954_v3  ;;  %vm3188_vm14 = vcmask 31744   ;;  %s3569_s18 = sshll.u32 %s5232_s21, 6 }
  0xa4   : > { %4101 = vmatprep.mubr.msk.f32.mxu0 %vm392_vm0, %v5259_v6  ;;  %v387_v8 = vld [vmem:[#allocation7] sm:$0xff]  ;;  %4494 = vmatprep.subr.bf16.mxu0 %v4493_v4  ;;  %v827_v16 = vld [vmem:[#allocation7 + $0x30] sm:$0xff]  ;;  %v5294_v17 = vld [vmem:[%s5236_s7 + $0x68] sm:$0xff]  ;;  %1244 = vst.msk [vmem:[#allocation2 + $0x18] sm:$0xff] %vm1232_vm1, %v4954_v3  ;;  %s6174_s29 = scalar_lea.vmem [#allocation13], %s3569_s18  ;;  %s3838_s17 = sshll.u32 %s4935_s26, 10 }
  0xa5   : > { %v4497_v10 = vpack.c.bf16 %v388_v9, %v387_v8  ;;  %4496 = vmatpush3.bf16.msra.mxu0 %v4493_v4  ;;  %2885 = vrot.lane.b32.xlu0 %v5264_v7, %s4952_s8  ;;  %v5289_v15 = vld [vmem:[%s5236_s7 + $0x60] sm:$0xff]  ;;  %v828_v18 = vld [vmem:[#allocation7 + $0x38] sm:$0xff]  ;;  %v5301_v19 = vld [vmem:[%s5236_s7 + $0x50] sm:$0xff]  ;;  %1245 = vst.msk [vmem:[#allocation2 + $0x28] sm:$0xff] %vm1232_vm1, %v4954_v3  ;;  %s3427_s23 = sshll.u32 %s6174_s29, 4  ;;  %s6228_s15 = scalar_lea.hbm %s6288_s6, %s3838_s17  ;;  %s6230_s23 = int_to_ptr.vmem [resolvable:$true] %s3427_s23 }
  0xa6   : > { %4153 = vmatprep.mubr.msk.f32.mxu1 %vm392_vm0, %v5289_v15  ;;  %v5304_v20 = vld [vmem:[%s5236_s7 + $0x70] sm:$0xff]  ;;  %v4501_v21 = vpack.c.bf16 %v828_v18, %v827_v16  ;;  %v5311_v22 = vld [vmem:[%s5236_s7 + $0x58] sm:$0xff]  ;;  %v5325_v24 = vld [vmem:[%s5236_s7 + $0x80] sm:$0xff]  ;;  %1246 = vst.msk [vmem:[#allocation2 + $0x38] sm:$0xff] %vm1232_vm1, %v4954_v3  ;;  %s3412_s26 = scalar_lea.sflag [#allocation6], %s5232_s21  ;;  %s4853_s20 = scalar_lea.vmem %s6230_s23, 1024 }
  0xa7   : > { %4498 = vmatprep.subr.bf16.mxu0 %v4497_v10  ;;  %2889 = vrot.lane.b32.xlu1 %v5269_v11, %s4952_s8  ;;  %v5320_v23 = vld [vmem:[%s5236_s7 + $0x78] sm:$0xff]  ;;  %v5338_v25 = vld [vmem:[%s5236_s7 + $0x88] sm:$0xff]  ;;  %v5343_v26 = vld [vmem:[%s5236_s7 + $0x90] sm:$0xff]  ;;  %1247 = vst.msk [vmem:[#allocation2 + $0x48] sm:$0xff] %vm1232_vm1, %v4954_v3  ;;  %p4854_p8 = scmp.ne.s32.totalorder %s6230_s23, %s4853_s20  ;;  %s4958_s19 = smov [#allocation13]  }
  0xa8   : > { %4509 = vmatprep.subr.bf16.mxu1 %v4497_v10  ;;  %4102 = vmatmul.mubr.msk.f32.vlgmr.msra.gmra.mrb[0].mxu0 %vm392_vm0, %v5272_v12  ;;  %v5356_v27 = vld [vmem:[%s5236_s7 + $0x98] sm:$0xff]  ;;  %v3588_v28 = vld [vmem:[%s5236_s7 + $0xa0] sm:$0xff]  ;;  %v3589_v29 = vld [vmem:[%s5236_s7 + $0xa8] sm:$0xff]  ;;  %1248 = vst.msk [vmem:[#allocation2 + $0x58] sm:$0xff] %vm1232_vm1, %v4954_v3  ;;  %s4857_s14 = sshll.u32 %s4958_s19, 4  ;;  %s4858_s14 = int_to_ptr.vmem [resolvable:$false] %s4857_s14 }
  0xa9   : > { %4510 = vmatpush3.bf16.msra.mxu1 %v4497_v10  ;;  %4500 = vmatpush3.bf16.msra.mxu0 %v4497_v10  ;;  %v344_v30 = vld [vmem:[%s5236_s7] sm:$0xff]  ;;  %v825_v32 = vld [vmem:[#allocation7 + $0x18] sm:$0xff]  ;;  %1249 = vst.msk [vmem:[#allocation2 + $0x68] sm:$0xff] %vm1232_vm1, %v4954_v3  ;;  %1250 = vst.msk [vmem:[#allocation2 + $0x78] sm:$0xff] %vm1232_vm1, %v4954_v3  ;;  %p4855_p6 = pnand %p4854_p8, %p5176_p5  ;;  %s4859_s12 = scalar_lea.vmem %s4858_s14, 2048 }
  0xaa   : > { %4104 = vmatprep.mubr.msk.f32.mxu0 %vm392_vm0, %v5251_v1  ;;  %2891 = vrot.lane.b32.xlu0 %v5279_v13, %s4952_s8  ;;  %v824_v31 = vld [vmem:[#allocation7 + $0x10] sm:$0xff]  ;;  %v345_v33 = vld [vmem:[%s5236_s7 + $0x8] sm:$0xff]  ;;  %1251 = vst.msk [vmem:[#allocation2 + $0x88] sm:$0xff] %vm1232_vm1, %v4954_v3  ;;  %1252 = vst.msk [vmem:[#allocation2 + $0x98] sm:$0xff] %vm1232_vm1, %v4954_v3  ;;  %p4860_p3 = scmp.lt.s32.totalorder %s6230_s23, %s4858_s14  ;;  %p4861_p7 = scmp.lt.s32.totalorder %s4859_s12, %s4853_s20 }
  0xab   : > { %2893 = vrot.lane.b32.xlu1 %v5284_v14, %s4952_s8  ;;  %4502 = vmatprep.subr.bf16.mxu0 %v4501_v21  ;;  %v4505_v34 = vpack.c.bf16 %v825_v32, %v824_v31  ;;  %1258 = vst.msk [vmem:[#allocation2 + $0x8] sm:$0xff] %vm1232_vm1, %v4954_v3  ;;  %1261 = vst.msk [vmem:[#allocation2 + $0x98] sm:$0xff] %vm1232_vm1, %v4954_v3  ;;  %v1301_v4 = vld [vmem:[#allocation9 + $0x18] sm:$0xff]  ;;  %p4856_p10 = pneg %p4855_p6 }
  0xac   : > { %4154 = vmatmul.mubr.msk.f32.vlgmr.msra.gmra.mrb[0].mxu1 %vm392_vm0, %v5294_v17  ;;  %4105 = vmatmul.mubr.msk.f32.gmra.mrb[2].mxu0 %vm392_vm0, %v5264_v7  ;;  %p4862_p9 = por %p4861_p7, %p4860_p3 }
  0xad   : > { %4156 = vmatprep.mubr.msk.f32.mxu1 %vm392_vm0, %v5304_v20  ;;  %4107 = vmatprep.mubr.msk.f32.mxu0 %vm392_vm0, %v5256_v5 }
  0xae   : > { %2895 = vrot.lane.b32.xlu0 %v5301_v19, %s4952_s8  ;;  %4233 = vmatprep.subr.mxu1 %v1301_v4  ;;  %p4863_p0 = pnand %p4862_p9, %p4856_p10 }
  0xaf   : > { %2897 = vrot.lane.b32.xlu1 %v5311_v22, %s4952_s8  ;;  %4234 = vmatpush3.msra.mxu1 %v1301_v4 }
  0xb0   : > { %4157 = vmatmul.mubr.msk.f32.gmra.mrb[2].mxu1 %vm392_vm0, %v5320_v23  ;;  %4108 = vmatmul.mubr.msk.f32.gmra.mrb[4].mxu0 %vm392_vm0, %v5269_v11 }
  0xb1   : > { %4159 = vmatprep.mubr.msk.f32.mxu1 %vm392_vm0, %v5325_v24  ;;  %4110 = vmatprep.mubr.msk.f32.mxu0 %vm392_vm0, %v5279_v13 }
  0xb2   : > { %2899 = vrot.lane.b32.xlu0 %v5289_v15, %s4952_s8 }
  0xb3   : > { %2901 = vrot.lane.b32.xlu1 %v5294_v17, %s4952_s8 }
  0xb4   : > { %4160 = vmatmul.mubr.msk.f32.gmra.mrb[4].mxu1 %vm392_vm0, %v5338_v25  ;;  %4111 = vmatmul.mubr.msk.f32.gmra.mrb[6].mxu0 %vm392_vm0, %v5284_v14 }
  0xb5   : > { %4162 = vmatprep.mubr.msk.f32.mxu1 %vm392_vm0, %v5343_v26  ;;  %4113 = vmatprep.mubr.msk.f32.mxu0 %vm392_vm0, %v5301_v19 }
  0xb6   : > { %2903 = vrot.lane.b32.xlu0 %v5304_v20, %s4952_s8 }
  0xb7   : > { %2905 = vrot.lane.b32.xlu1 %v5320_v23, %s4952_s8 }
  0xb8   : > { %4163 = vmatmul.mubr.msk.f32.gmra.mrb[6].mxu1 %vm392_vm0, %v5356_v27  ;;  %4114 = vmatmul.mubr.msk.f32.gmra.mrb[8].mxu0 %vm392_vm0, %v5311_v22 }
  0xb9   : > { %4116 = vmatprep.mubr.msk.f32.mxu0 %vm392_vm0, %v5289_v15 }
  0xba   : > { %2907 = vrot.lane.b32.xlu0 %v5325_v24, %s4952_s8 }
  0xbb   : > { %2909 = vrot.lane.b32.xlu1 %v5338_v25, %s4952_s8 }
  0xbc   : > { %4117 = vmatmul.mubr.msk.f32.gmra.mrb[10].mxu0 %vm392_vm0, %v5294_v17 }
  0xbd   : > { %4119 = vmatprep.mubr.msk.f32.mxu0 %vm392_vm0, %v5304_v20 }
  0xbe   : > { %2911 = vrot.lane.b32.xlu0 %v5343_v26, %s4952_s8 }
  0xbf   : > { %2913 = vrot.lane.b32.xlu1 %v5356_v27, %s4952_s8 }
  0xc0   : > { %4120 = vmatmul.mubr.msk.f32.gmra.mrb[12].mxu0 %vm392_vm0, %v5320_v23 }
  0xc1   : > { %4122 = vmatprep.mubr.msk.f32.mxu0 %vm392_vm0, %v5325_v24 }
  0xc4   : > { %4123 = vmatmul.mubr.msk.f32.gmra.mrb[14].mxu0 %vm392_vm0, %v5338_v25 }
  0xc5   : > { %4125 = vmatprep.mubr.msk.f32.mxu0 %vm392_vm0, %v5343_v26 }
  0xc8   : > { %4126 = vmatmul.mubr.msk.f32.gmra.mrb[16].mxu0 %vm392_vm0, %v5356_v27 }
  0xc9   : > { %4128 = vmatprep.mubr.msk.f32.mxu0 %vm392_vm0, %v3588_v28 }
  0xcc   : > { %4129 = vmatmul.mubr.msk.f32.gmra.mrb[18].mxu0 %vm392_vm0, %v3589_v29 }
  0xcd   : > { %4135 = vmatprep.mubr.msk.f32.mxu0 %vm392_vm0, %v344_v30 }
  0xd0   : > { %4136 = vmatmul.mubr.msk.f32.vlgmr.msra.gmra.mrb[20].mxu0 %vm392_vm0, %v345_v33 }
  0xd1   : > { %4504 = vmatpush3.bf16.msra.mxu0 %v4501_v21  ;;  %4138 = vmatprep.mubr.msk.f32.mxu0 %vm392_vm0, %v5259_v6 }
  0xd2   : > { %4506 = vmatprep.subr.bf16.mxu0 %v4505_v34 }
  0xd4   : > { %4139 = vmatmul.mubr.msk.f32.gmra.mrb[22].mxu0 %vm392_vm0, %v5272_v12 }
  0xd5   : > { %4141 = vmatprep.mubr.msk.f32.mxu0 %vm392_vm0, %v5251_v1 }
  0xd8   : > { %4142 = vmatmul.mubr.msk.f32.gmra.mrb[24].mxu0 %vm392_vm0, %v5264_v7 }
  0xd9   : > { %4144 = vmatprep.mubr.msk.f32.mxu0 %vm392_vm0, %v5256_v5 }
  0xdc   : > { %4145 = vmatmul.mubr.msk.f32.gmra.mrb[26].mxu0 %vm392_vm0, %v5269_v11 }
  0xdd   : > { %4147 = vmatprep.mubr.msk.f32.mxu0 %vm392_vm0, %v5279_v13 }
  0xe0   : > { %4148 = vmatmul.mubr.msk.f32.gmra.mrb[28].mxu0 %vm392_vm0, %v5284_v14 }
  0xe1   : > { %4150 = vmatprep.mubr.msk.f32.mxu0 %vm392_vm0, %v5301_v19 }
  0xe4   : > { %4151 = vmatmul.mubr.msk.f32.gmra.mrb[30].mxu0 %vm392_vm0, %v5311_v22 }
  0xe5   : > { %4169 = vmatprep.mubr.msk.f32.mxu0 %vm392_vm0, %v5259_v6 }
  0xe8   : > { %4170 = vmatmul.mubr.msk.f32.vlgmr.msra.gmra.mrb[32].mxu0 %vm392_vm0, %v5272_v12 }
  0xe9   : > { %4508 = vmatpush3.bf16.msra.mxu0 %v4505_v34  ;;  %4172 = vmatprep.mubr.msk.f32.mxu0 %vm392_vm0, %v5251_v1 }
  0xec   : > { %4173 = vmatmul.mubr.msk.f32.gmra.mrb[34].mxu0 %vm392_vm0, %v5264_v7 }
  0xed   : > { %4175 = vmatprep.mubr.msk.f32.mxu0 %vm392_vm0, %v5256_v5 }
  0xf0   : > { %4176 = vmatmul.mubr.msk.f32.gmra.mrb[36].mxu0 %vm392_vm0, %v5269_v11 }
  0xf1   : > { %4178 = vmatprep.mubr.msk.f32.mxu0 %vm392_vm0, %v5279_v13 }
  0xf4   : > { %4179 = vmatmul.mubr.msk.f32.gmra.mrb[38].mxu0 %vm392_vm0, %v5284_v14 }
  0xf5   : > { %4181 = vmatprep.mubr.msk.f32.mxu0 %vm392_vm0, %v5301_v19 }
  0xf8   : > { %4182 = vmatmul.mubr.msk.f32.gmra.mrb[40].mxu0 %vm392_vm0, %v5311_v22 }
  0xf9   : > { %4184 = vmatprep.mubr.msk.f32.mxu0 %vm392_vm0, %v5289_v15 }
  0xfc   : > { %4185 = vmatmul.mubr.msk.f32.gmra.mrb[42].mxu0 %vm392_vm0, %v5294_v17 }
  0xfd   : > { %4187 = vmatprep.mubr.msk.f32.mxu0 %vm392_vm0, %v5304_v20 }
 0x100   : > { %4188 = vmatmul.mubr.msk.f32.gmra.mrb[44].mxu0 %vm392_vm0, %v5320_v23 }
 0x101   : > { %4190 = vmatprep.mubr.msk.f32.mxu0 %vm392_vm0, %v5325_v24 }
 0x104   : > { %4191 = vmatmul.mubr.msk.f32.gmra.mrb[46].mxu0 %vm392_vm0, %v5338_v25 }
 0x105   : > { %4193 = vmatprep.mubr.msk.f32.mxu0 %vm392_vm0, %v5343_v26 }
 0x108   : > { %4194 = vmatmul.mubr.msk.f32.gmra.mrb[48].mxu0 %vm392_vm0, %v5356_v27 }
 0x109   : > { %4196 = vmatprep.mubr.msk.f32.mxu0 %vm392_vm0, %v3588_v28 }
 0x10c   : > { %4197 = vmatmul.mubr.msk.f32.gmra.mrb[50].mxu0 %vm392_vm0, %v3589_v29 }
 0x10d   : > { %4203 = vmatprep.mubr.msk.f32.mxu0 %vm392_vm0, %v344_v30 }
 0x110   : > { %4204 = vmatmul.mubr.msk.f32.vlgmr.msra.gmra.mrb[32].mxu0 %vm392_vm0, %v345_v33 }
 0x111   : > { %4206 = vmatprep.mubr.msk.f32.mxu0 %vm392_vm0, %v5259_v6 }
 0x113   : > { %v2884_v35 = vpop.permute.xlu0 %2883 }
 0x114   : > { %4207 = vmatmul.mubr.msk.f32.gmra.mrb[34].mxu0 %vm392_vm0, %v5272_v12  ;;  %v5461_v36 = vadd.f32 %v5259_v6, %v2884_v35 }
 0x115   : > { %4209 = vmatprep.mubr.msk.f32.mxu0 %vm392_vm0, %v5251_v1  ;;  %v2888_v37 = vpop.permute.xlu1 %2887 }
 0x116   : > { %v5466_v38 = vadd.f32 %v5251_v1, %v2888_v37  ;;  %2963 = vrot.lane.b32.xlu0 %v5461_v36, %s4953_s30 }
 0x117   : > { %v2886_v39 = vpop.permute.xlu0 %2885 }
 0x118   : > { %4210 = vmatmul.mubr.msk.f32.gmra.mrb[36].mxu0 %vm392_vm0, %v5264_v7  ;;  %v5473_v40 = vadd.f32 %v5272_v12, %v2886_v39  ;;  %v5600_v12 = vld [vmem:[#allocation9] sm:$0xff] }
 0x119   : > { %4212 = vmatprep.mubr.msk.f32.mxu0 %vm392_vm0, %v5256_v5  ;;  %v2890_v41 = vpop.permute.xlu1 %2889  ;;  %4259 = vmatprep.subr.mxu1 %v5600_v12 }
 0x11a   : > { %2965 = vrot.lane.b32.xlu1 %v5473_v40, %s4953_s30  ;;  %v5480_v42 = vadd.f32 %v5264_v7, %v2890_v41  ;;  %2967 = vrot.lane.b32.xlu0 %v5466_v38, %s4953_s30 }
 0x11c   : > { %4213 = vmatmul.mubr.msk.f32.gmra.mrb[38].mxu0 %vm392_vm0, %v5269_v11  ;;  %v2892_v43 = vpop.permute.xlu0 %2891 }
 0x11d   : > { %4215 = vmatprep.mubr.msk.f32.mxu0 %vm392_vm0, %v5279_v13  ;;  %v2894_v44 = vpop.permute.xlu1 %2893  ;;  %v5489_v45 = vadd.f32 %v5256_v5, %v2892_v43  ;;  %v1280_v5 = vld [vmem:[#allocation9 + $0x8] sm:$0xff] }
 0x11e   : > { %2969 = vrot.lane.b32.xlu1 %v5480_v42, %s4953_s30  ;;  %v5494_v46 = vadd.f32 %v5269_v11, %v2894_v44  ;;  %4311 = vmatprep.subr.mxu0 %v1280_v5 }
 0x11f   : > { %2971 = vrot.lane.b32.xlu0 %v5489_v45, %s4953_s30  ;;  %4312 = vmatpush3.msra.mxu0 %v1280_v5 }
 0x120   : > { %4216 = vmatmul.mubr.msk.f32.gmra.mrb[40].mxu0 %vm392_vm0, %v5284_v14  ;;  %v2896_v47 = vpop.permute.xlu0 %2895 }
 0x121   : > { %4218 = vmatprep.mubr.msk.f32.mxu0 %vm392_vm0, %v5301_v19  ;;  %v2898_v48 = vpop.permute.xlu1 %2897  ;;  %v5503_v49 = vadd.f32 %v5279_v13, %v2896_v47 }
 0x122   : > { %2973 = vrot.lane.b32.xlu1 %v5494_v46, %s4953_s30  ;;  %v5508_v50 = vadd.f32 %v5284_v14, %v2898_v48 }
 0x123   : > { %2975 = vrot.lane.b32.xlu0 %v5503_v49, %s4953_s30 }
 0x124   : > { %4219 = vmatmul.mubr.msk.f32.gmra.mrb[42].mxu0 %vm392_vm0, %v5311_v22  ;;  %v2900_v51 = vpop.permute.xlu0 %2899 }
 0x125   : > { %4221 = vmatprep.mubr.msk.f32.mxu0 %vm392_vm0, %v5289_v15  ;;  %v2902_v52 = vpop.permute.xlu1 %2901  ;;  %v5517_v53 = vadd.f32 %v5301_v19, %v2900_v51 }
 0x126   : > { %2977 = vrot.lane.b32.xlu1 %v5508_v50, %s4953_s30  ;;  %v5522_v54 = vadd.f32 %v5311_v22, %v2902_v52 }
 0x127   : > { %2979 = vrot.lane.b32.xlu0 %v5517_v53, %s4953_s30 }
 0x128   : > { %4222 = vmatmul.mubr.msk.f32.gmra.mrb[44].mxu0 %vm392_vm0, %v5294_v17  ;;  %v2904_v55 = vpop.permute.xlu0 %2903 }
 0x129   : > { %4224 = vmatprep.mubr.msk.f32.mxu0 %vm392_vm0, %v5304_v20  ;;  %v2906_v56 = vpop.permute.xlu1 %2905  ;;  %v5531_v57 = vadd.f32 %v5289_v15, %v2904_v55 }
 0x12a   : > { %2981 = vrot.lane.b32.xlu1 %v5522_v54, %s4953_s30  ;;  %v5536_v58 = vadd.f32 %v5294_v17, %v2906_v56  ;;  %v1179_v17 = vlaneseq }
 0x12b   : > { %2983 = vrot.lane.b32.xlu0 %v5531_v57, %s4953_s30 }
 0x12c   : > { %4225 = vmatmul.mubr.msk.f32.gmra.mrb[46].mxu0 %vm392_vm0, %v5320_v23  ;;  %v2908_v59 = vpop.permute.xlu0 %2907 }
 0x12d   : > { %4227 = vmatprep.mubr.msk.f32.mxu0 %vm392_vm0, %v5325_v24  ;;  %v2910_v60 = vpop.permute.xlu1 %2909  ;;  %v5545_v61 = vadd.f32 %v5304_v20, %v2908_v59 }
 0x12e   : > { %2985 = vrot.lane.b32.xlu1 %v5536_v58, %s4953_s30  ;;  %v5550_v62 = vadd.f32 %v5320_v23, %v2910_v60  ;;  %v5607_v23 = vshrl.u32 %v1179_v17, 7 }
 0x12f   : > { %2987 = vrot.lane.b32.xlu0 %v5545_v61, %s4953_s30 }
 0x130   : > { %4228 = vmatmul.mubr.msk.f32.gmra.mrb[48].mxu0 %vm392_vm0, %v5338_v25  ;;  %v2912_v63 = vpop.permute.xlu0 %2911  ;;  %vm1181_vm2 = vcmp.lt.s32.totalorder %v5607_v23, 7  ;;  %vm2810_vm15 = vcmp.lt.s32.totalorder %v5607_v23, 1 }
 0x131   : > { %4230 = vmatprep.mubr.msk.f32.mxu0 %vm392_vm0, %v5343_v26  ;;  %v2914_v0 = vpop.permute.xlu1 %2913  ;;  %v5559_v1 = vadd.f32 %v5325_v24, %v2912_v63  ;;  %v5628_v63 = vld [vmem:[#allocation9 + $0x38] sm:$0xff] }
 0x132   : > { %2989 = vrot.lane.b32.xlu1 %v5550_v62, %s4953_s30  ;;  %v5564_v2 = vadd.f32 %v5338_v25, %v2914_v0  ;;  %4415 = vmatprep.subr.mxu0 %v5628_v63 }
 0x133   : > { %2991 = vrot.lane.b32.xlu0 %v5559_v1, %s4953_s30 }
 0x134   : > { %4231 = vmatmul.mubr.msk.f32.gmra.mrb[50].mxu0 %vm392_vm0, %v5356_v27 }
 0x136   : > { %2993 = vrot.lane.b32.xlu1 %v5564_v2, %s4953_s30 }
 0x17b   : > { %v4103_v6 = vpop.f32.mrb[0].mxu0 }
 0x17c   : > { %v5596_v7 = vpop.f32.mrb[1].mxu0 }
 0x17f   : > { %v4155_v8 = vpop.f32.mrb[0].mxu1  ;;  %v4106_v9 = vpop.f32.mrb[2].mxu0 }
 0x180   : > { %v788_v10 = vpop.f32.mrb[1].mxu1  ;;  %v5598_v11 = vpop.f32.mrb[3].mxu0 }
 0x183   : > { %v4158_v13 = vpop.f32.mrb[2].mxu1  ;;  %v4109_v14 = vpop.f32.mrb[4].mxu0 }
 0x184   : > { %v797_v15 = vpop.f32.mrb[3].mxu1  ;;  %v5603_v16 = vpop.f32.mrb[5].mxu0 }
 0x187   : > { %v4161_v18 = vpop.f32.mrb[4].mxu1  ;;  %v4112_v19 = vpop.f32.mrb[6].mxu0 }
 0x188   : > { %v806_v20 = vpop.f32.mrb[5].mxu1  ;;  %v5605_v21 = vpop.f32.mrb[7].mxu0 }
 0x189   : > { %v2964_v22 = vpop.permute.xlu0 %2963 }
 0x18a   : > { %v3011_v28 = vrot.slane %v2964_v22, 1 }
 0x18b   : > { %v4164_v24 = vpop.f32.mrb[6].mxu1  ;;  %v4115_v25 = vpop.f32.mrb[8].mxu0 }
 0x18c   : > { %v815_v26 = vpop.f32.mrb[7].mxu1  ;;  %v5609_v27 = vpop.f32.mrb[9].mxu0 }
 0x18d   : > { %v2966_v29 = vpop.permute.xlu1 %2965  ;;  %v2968_v30 = vpop.permute.xlu0 %2967 }
 0x18e   : > { %v3019_v31 = vrot.slane %v2966_v29, 1  ;;  %v3012_v37 = vrot.slane %v2968_v30, 1 }
 0x18f   : > { %v4118_v32 = vpop.f32.mrb[10].mxu0 }
 0x190   : > { %v5612_v33 = vpop.f32.mrb[11].mxu0  ;;  %v3035_v34 = vsel %vm1181_vm2, %v3019_v31, %v3011_v28  ;;  %v3027_v35 = vsel %vm1181_vm2, %v3011_v28, %v3019_v31 }
 0x191   : > { %v2970_v39 = vpop.permute.xlu1 %2969  ;;  %3061 = vrot.lane.b32.xlu1 %v3035_v34, %s4955_s10  ;;  %3059 = vrot.lane.b32.xlu0 %v3027_v35, %s4955_s10  ;;  %v2972_v41 = vpop.permute.xlu0 %2971 }
 0x192   : > { %v3020_v43 = vrot.slane %v2970_v39, 1  ;;  %v3013_v52 = vrot.slane %v2972_v41, 1 }
 0x193   : > { %v4121_v44 = vpop.f32.mrb[12].mxu0 }
 0x194   : > { %v573_v47 = vpop.f32.mrb[13].mxu0  ;;  %v3036_v48 = vsel %vm1181_vm2, %v3020_v43, %v3012_v37  ;;  %v3028_v51 = vsel %vm1181_vm2, %v3012_v37, %v3020_v43 }
 0x195   : > { %v5624_v55 = vadd.f32 %v788_v10, %v573_v47  ;;  %v2974_v56 = vpop.permute.xlu1 %2973  ;;  %3065 = vrot.lane.b32.xlu1 %v3036_v48, %s4955_s10  ;;  %3063 = vrot.lane.b32.xlu0 %v3028_v51, %s4955_s10  ;;  %v2976_v59 = vpop.permute.xlu0 %2975 }
 0x196   : > { %v3021_v60 = vrot.slane %v2974_v56, 1  ;;  %v3014_v8 = vrot.slane %v2976_v59, 1 }
 0x197   : > { %v4124_v0 = vpop.f32.mrb[14].mxu0 }
 0x198   : > { %v582_v4 = vpop.f32.mrb[15].mxu0  ;;  %v3037_v5 = vsel %vm1181_vm2, %v3021_v60, %v3013_v52  ;;  %v3029_v6 = vsel %vm1181_vm2, %v3013_v52, %v3021_v60 }
 0x199   : > { %v5635_v9 = vadd.f32 %v797_v15, %v582_v4  ;;  %v2978_v10 = vpop.permute.xlu1 %2977  ;;  %3069 = vrot.lane.b32.xlu1 %v3037_v5, %s4955_s10  ;;  %3067 = vrot.lane.b32.xlu0 %v3029_v6, %s4955_s10  ;;  %v2980_v13 = vpop.permute.xlu0 %2979 }
 0x19a   : > { %v3022_v14 = vrot.slane %v2978_v10, 1  ;;  %v3015_v24 = vrot.slane %v2980_v13, 1 }
 0x19b   : > { %v4127_v17 = vpop.f32.mrb[16].mxu0 }
 0x19c   : > { %v591_v18 = vpop.f32.mrb[17].mxu0  ;;  %v3038_v19 = vsel %vm1181_vm2, %v3022_v14, %v3014_v8  ;;  %v3030_v22 = vsel %vm1181_vm2, %v3014_v8, %v3022_v14 }
 0x19d   : > { %v5643_v25 = vadd.f32 %v806_v20, %v591_v18  ;;  %v2982_v15 = vpop.permute.xlu1 %2981  ;;  %3073 = vrot.lane.b32.xlu1 %v3038_v19, %s4955_s10  ;;  %3071 = vrot.lane.b32.xlu0 %v3030_v22, %s4955_s10  ;;  %v2984_v28 = vpop.permute.xlu0 %2983 }
 0x19e   : > { %v3023_v29 = vrot.slane %v2982_v15, 1  ;;  %v3016_v35 = vrot.slane %v2984_v28, 1 }
 0x19f   : > { %v4130_v30 = vpop.f32.mrb[18].mxu0 }
 0x1a0   : > { %v600_v31 = vpop.f32.mrb[19].mxu0  ;;  %v3039_v32 = vsel %vm1181_vm2, %v3023_v29, %v3015_v24  ;;  %v3031_v34 = vsel %vm1181_vm2, %v3015_v24, %v3023_v29 }
 0x1a1   : > { %v5651_v37 = vadd.f32 %v815_v26, %v600_v31  ;;  %v2986_v20 = vpop.permute.xlu1 %2985  ;;  %3077 = vrot.lane.b32.xlu1 %v3039_v32, %s4955_s10  ;;  %3075 = vrot.lane.b32.xlu0 %v3031_v34, %s4955_s10  ;;  %v2988_v39 = vpop.permute.xlu0 %2987 }
 0x1a2   : > { %v3024_v41 = vrot.slane %v2986_v20, 1  ;;  %v3017_v51 = vrot.slane %v2988_v39, 1 }
 0x1a3   : > { %v4137_v43 = vpop.f32.mrb[20].mxu0 }
 0x1a4   : > { %v734_v44 = vpop.f32.mrb[21].mxu0  ;;  %v3040_v47 = vsel %vm1181_vm2, %v3024_v41, %v3016_v35  ;;  %v3032_v48 = vsel %vm1181_vm2, %v3016_v35, %v3024_v41 }
 0x1a5   : > { %v735_v52 = vadd.f32 %v734_v44, %v5596_v7  ;;  %v2990_v26 = vpop.permute.xlu1 %2989  ;;  %3081 = vrot.lane.b32.xlu1 %v3040_v47, %s4955_s10  ;;  %3079 = vrot.lane.b32.xlu0 %v3032_v48, %s4955_s10  ;;  %v2992_v56 = vpop.permute.xlu0 %2991 }
 0x1a6   : > { %v3025_v59 = vrot.slane %v2990_v26, 1  ;;  %v3018_v6 = vrot.slane %v2992_v56, 1 }
 0x1a7   : > { %v4140_v60 = vpop.f32.mrb[22].mxu0 }
 0x1a8   : > { %v743_v0 = vpop.f32.mrb[23].mxu0  ;;  %v3041_v4 = vsel %vm1181_vm2, %v3025_v59, %v3017_v51  ;;  %v3033_v5 = vsel %vm1181_vm2, %v3017_v51, %v3025_v59 }
 0x1a9   : > { %v744_v8 = vadd.f32 %v743_v0, %v5598_v11  ;;  %v2994_v10 = vpop.permute.xlu1 %2993  ;;  %3085 = vrot.lane.b32.xlu1 %v3041_v4, %s4955_s10  ;;  %3083 = vrot.lane.b32.xlu0 %v3033_v5, %s4955_s10 }
 0x1aa   : > { %v3026_v7 = vrot.slane %v2994_v10, 1 }
 0x1ab   : > { %v4143_v13 = vpop.f32.mrb[24].mxu0 }
 0x1ac   : > { %v752_v14 = vpop.f32.mrb[25].mxu0  ;;  %v3042_v17 = vsel %vm1181_vm2, %v3026_v7, %v3018_v6  ;;  %v3034_v18 = vsel %vm1181_vm2, %v3018_v6, %v3026_v7 }
 0x1ad   : > { %v753_v19 = vadd.f32 %v752_v14, %v5603_v16  ;;  %3089 = vrot.lane.b32.xlu1 %v3042_v17, %s4955_s10  ;;  %3087 = vrot.lane.b32.xlu0 %v3034_v18, %s4955_s10 }
 0x1af   : > { %v4146_v11 = vpop.f32.mrb[26].mxu0 }
 0x1b0   : > { %v761_v22 = vpop.f32.mrb[27].mxu0 }
 0x1b1   : > { %v762_v24 = vadd.f32 %v761_v22, %v5605_v21 }
 0x1b3   : > { %v4149_v15 = vpop.f32.mrb[28].mxu0 }
 0x1b4   : > { %v770_v28 = vpop.f32.mrb[29].mxu0 }
 0x1b5   : > { %v771_v29 = vadd.f32 %v770_v28, %v5609_v27  ;;  %v5693_v28 = vld [vmem:[#allocation2 + $0x8] sm:$0xff] }
 0x1b7   : > { %v4152_v30 = vpop.f32.mrb[30].mxu0 }
 0x1b8   : > { %v779_v31 = vpop.f32.mrb[31].mxu0 }
 0x1b9   : > { %v5679_v32 = vadd.f32 %v779_v31, %v5612_v33 }
 0x1e3   : > { %v4205_v34 = vpop.f32.mrb[32].mxu0 }
 0x1e4   : > { %v1169_v35 = vrot.slane %v4205_v34, 1  ;;  %v1060_v16 = vpop.f32.mrb[33].mxu0 }
 0x1e5   : > { %v1159_v20 = vrot.slane %v1060_v16, 1 }
 0x1e7   : > { %v1182_v39 = vsel %vm1181_vm2, %v1159_v20, %v1169_v35  ;;  %v4208_v41 = vpop.f32.mrb[34].mxu0 }
 0x1e8   : > { %v1192_v43 = vadd.f32 %v1182_v39, %v735_v52  ;;  %v1170_v44 = vrot.slane %v4208_v41, 1  ;;  %v1070_v21 = vpop.f32.mrb[35].mxu0 }
 0x1e9   : > { %v1160_v47 = vrot.slane %v1070_v21, 1  ;;  %v5714_v21 = vld [vmem:[#allocation9 + $0x20] sm:$0xff] }
 0x1ea   : > { %vm1202_vm3 = vcmp.ge.f32.partialorder %v1192_v43, 0.0  ;;  %v1212_v48 = vmul.f32 0.2, %v1192_v43 }
 0x1eb   : > { %v1183_v27 = vsel %vm1181_vm2, %v1160_v47, %v1170_v44  ;;  %v4211_v51 = vpop.f32.mrb[36].mxu0 }
 0x1ec   : > { %v1222_v33 = vsel %vm1202_vm3, %v1192_v43, %v1212_v48  ;;  %v1193_v26 = vadd.f32 %v1183_v27, %v744_v8  ;;  %v1171_v56 = vrot.slane %v4211_v51, 1  ;;  %v1080_v59 = vpop.f32.mrb[37].mxu0  ;;  %v5723_v48 = vld [vmem:[#allocation2 + $0x28] sm:$0xff] }
 0x1ed   : > { %1233 = vst.msk [vmem:[#allocation2] sm:$0xff] %vm1232_vm1, %v1222_v33  ;;  %v1161_v60 = vrot.slane %v1080_v59, 1  ;;  %v5725_v27 = vld [vmem:[#allocation10] sm:$0xf] }
 0x1ee   : > { %1257 = vst.msk [vmem:[#allocation2] sm:$0xff] %vm1232_vm1, %v4954_v3  ;;  %vm1203_vm4 = vcmp.ge.f32.partialorder %v1193_v26, 0.0  ;;  %v1213_v52 = vmul.f32 0.2, %v1193_v26 }
 0x1ef   : > { %v1184_v0 = vsel %vm1181_vm2, %v1161_v60, %v1171_v56  ;;  %v4214_v4 = vpop.f32.mrb[38].mxu0 }
 0x1f0   : > { %v1223_v5 = vsel %vm1203_vm4, %v1193_v26, %v1213_v52  ;;  %v1194_v6 = vadd.f32 %v1184_v0, %v753_v19  ;;  %v1172_v10 = vrot.slane %v4214_v4, 1  ;;  %v1090_v7 = vpop.f32.mrb[39].mxu0  ;;  %v5744_v0 = vld [vmem:[#allocation2 + $0x38] sm:$0xff] }
 0x1f1   : > { %1234 = vst.msk [vmem:[#allocation2 + $0x10] sm:$0xff] %vm1232_vm1, %v1223_v5  ;;  %v1162_v8 = vrot.slane %v1090_v7, 1 }
 0x1f2   : > { %vm1204_vm5 = vcmp.ge.f32.partialorder %v1194_v6, 0.0  ;;  %v1214_v13 = vmul.f32 0.2, %v1194_v6 }
 0x1f3   : > { %v1185_v14 = vsel %vm1181_vm2, %v1162_v8, %v1172_v10  ;;  %v4217_v17 = vpop.f32.mrb[40].mxu0 }
 0x1f4   : > { %v1224_v18 = vsel %vm1204_vm5, %v1194_v6, %v1214_v13  ;;  %v1195_v11 = vadd.f32 %v1185_v14, %v762_v24  ;;  %v1173_v22 = vrot.slane %v4217_v17, 1  ;;  %v1100_v15 = vpop.f32.mrb[41].mxu0  ;;  %v5704_v24 = vld [vmem:[#allocation2 + $0x18] sm:$0xff] }
 0x1f5   : > { %1235 = vst.msk [vmem:[#allocation2 + $0x20] sm:$0xff] %vm1232_vm1, %v1224_v18  ;;  %v1163_v19 = vrot.slane %v1100_v15, 1  ;;  %v5696_v30 = vld [vmem:[#allocation2] sm:$0xff]  ;;  %v5760_v18 = vld [vmem:[#allocation2 + $0x48] sm:$0xff] }
 0x1f6   : > { %vm1205_vm6 = vcmp.ge.f32.partialorder %v1195_v11, 0.0  ;;  %v1215_v31 = vmul.f32 0.2, %v1195_v11  ;;  %4313 = vmatprep.mubr.msk.f32.mxu0 %vm1232_vm1, %v5696_v30 }
 0x1f7   : > { %v1186_v34 = vsel %vm1181_vm2, %v1163_v19, %v1173_v22  ;;  %v4220_v35 = vpop.f32.mrb[42].mxu0  ;;  %4314 = vmatmul.mubr.msk.f32.vlgmr.msra.gmra.mrb[52].mxu0 %vm1232_vm1, %v5693_v28 }
 0x1f8   : > { %v1225_v16 = vsel %vm1205_vm6, %v1195_v11, %v1215_v31  ;;  %v1196_v20 = vadd.f32 %v1186_v34, %v771_v29  ;;  %v1174_v39 = vrot.slane %v4220_v35, 1  ;;  %v1110_v41 = vpop.f32.mrb[43].mxu0  ;;  %v5706_v43 = vld [vmem:[#allocation2 + $0x10] sm:$0xff]  ;;  %4416 = vmatpush3.msra.mxu0 %v5628_v63 }
 0x1f9   : > { %1236 = vst.msk [vmem:[#allocation2 + $0x30] sm:$0xff] %vm1232_vm1, %v1225_v16  ;;  %v1164_v44 = vrot.slane %v1110_v41, 1  ;;  %4235 = vmatprep.mubr.msk.f32.mxu1 %vm1232_vm1, %v5706_v43  ;;  %4316 = vmatprep.mubr.msk.f32.mxu0 %vm1232_vm1, %v5706_v43 }
 0x1fa   : > { %vm1206_vm7 = vcmp.ge.f32.partialorder %v1196_v20, 0.0  ;;  %v1216_v47 = vmul.f32 0.2, %v1196_v20  ;;  %4236 = vmatmul.mubr.msk.f32.vlgmr.msra.gmra.mrb[8].mxu1 %vm1232_vm1, %v5704_v24  ;;  %4467 = vmatprep.subr.msk.mxu0 %vm3221_vm8, %v5725_v27 }
 0x1fb   : > { %v1187_v29 = vsel %vm1181_vm2, %v1164_v44, %v1174_v39  ;;  %v4223_v63 = vpop.f32.mrb[44].mxu0  ;;  %4260 = vmatpush3.msra.mxu1 %v5600_v12  ;;  %4317 = vmatmul.mubr.msk.f32.gmra.mrb[54].mxu0 %vm1232_vm1, %v5704_v24  ;;  %v5776_v44 = vld [vmem:[#allocation2 + $0x58] sm:$0xff] }
 0x1fc   : > { %v1226_v51 = vsel %vm1206_vm7, %v1196_v20, %v1216_v47  ;;  %v1197_v33 = vadd.f32 %v1187_v29, %v5679_v32  ;;  %v1175_v26 = vrot.slane %v4223_v63, 1  ;;  %v1120_v56 = vpop.f32.mrb[45].mxu0  ;;  %v5728_v59 = vld [vmem:[#allocation2 + $0x20] sm:$0xff]  ;;  %4285 = vmatprep.subr.mxu1 %v5714_v21 }
 0x1fd   : > { %1237 = vst.msk [vmem:[#allocation2 + $0x40] sm:$0xff] %vm1232_vm1, %v1226_v51  ;;  %v1165_v12 = vrot.slane %v1120_v56, 1  ;;  %4238 = vmatprep.mubr.msk.f32.mxu1 %vm1232_vm1, %v5728_v59  ;;  %4319 = vmatprep.mubr.msk.f32.mxu0 %vm1232_vm1, %v5728_v59 }
 0x1fe   : > { %vm1207_vm9 = vcmp.ge.f32.partialorder %v1197_v33, 0.0  ;;  %v1217_v32 = vmul.f32 0.2, %v1197_v33  ;;  %4239 = vmatmul.mubr.msk.f32.gmra.mrb[10].mxu1 %vm1232_vm1, %v5723_v48 }
 0x1ff   : > { %v1188_v60 = vsel %vm1181_vm2, %v1165_v12, %v1175_v26  ;;  %v4226_v52 = vpop.f32.mrb[46].mxu0  ;;  %4320 = vmatmul.mubr.msk.f32.gmra.mrb[56].mxu0 %vm1232_vm1, %v5723_v48 }
 0x200   : > { %v1227_v4 = vsel %vm1207_vm9, %v1197_v33, %v1217_v32  ;;  %v1198_v5 = vadd.f32 %v1188_v60, %v5624_v55  ;;  %v1176_v6 = vrot.slane %v4226_v52, 1  ;;  %v1130_v10 = vpop.f32.mrb[47].mxu0  ;;  %v5747_v7 = vld [vmem:[#allocation2 + $0x30] sm:$0xff] }
 0x201   : > { %1238 = vst.msk [vmem:[#allocation2 + $0x50] sm:$0xff] %vm1232_vm1, %v1227_v4  ;;  %v1166_v8 = vrot.slane %v1130_v10, 1  ;;  %4241 = vmatprep.mubr.msk.f32.mxu1 %vm1232_vm1, %v5747_v7  ;;  %4322 = vmatprep.mubr.msk.f32.mxu0 %vm1232_vm1, %v5747_v7 }
 0x202   : > { %vm1208_vm10 = vcmp.ge.f32.partialorder %v1198_v5, 0.0  ;;  %v1218_v13 = vmul.f32 0.2, %v1198_v5  ;;  %4242 = vmatmul.mubr.msk.f32.gmra.mrb[12].mxu1 %vm1232_vm1, %v5744_v0 }
 0x203   : > { %v1189_v55 = vsel %vm1181_vm2, %v1166_v8, %v1176_v6  ;;  %v3062_v14 = vpop.permute.xlu1 %3061  ;;  %v3060_v17 = vpop.permute.xlu0 %3059  ;;  %4323 = vmatmul.mubr.msk.f32.gmra.mrb[58].mxu0 %vm1232_vm1, %v5744_v0 }
 0x204   : > { %v1228_v11 = vsel %vm1208_vm10, %v1198_v5, %v1218_v13  ;;  %v1199_v22 = vadd.f32 %v1189_v55, %v5635_v9  ;;  %v3108_v15 = vadd.f32 %v3062_v14, %v5473_v40  ;;  %v3107_v19 = vadd.f32 %v3060_v17, %v5461_v36  ;;  %v4229_v31 = vpop.f32.mrb[48].mxu0  ;;  %v5765_v34 = vld [vmem:[#allocation2 + $0x40] sm:$0xff]  ;;  %v5796_v5 = vld [vmem:[#allocation2 + $0x68] sm:$0xff] }
 0x205   : > { %1239 = vst.msk [vmem:[#allocation2 + $0x60] sm:$0xff] %vm1232_vm1, %v1228_v11  ;;  %v1177_v35 = vrot.slane %v4229_v31, 1  ;;  %v1140_v16 = vpop.f32.mrb[49].mxu0  ;;  %4244 = vmatprep.mubr.msk.f32.mxu1 %vm1232_vm1, %v5765_v34  ;;  %4325 = vmatprep.mubr.msk.f32.mxu0 %vm1232_vm1, %v5765_v34 }
 0x206   : > { %vm1209_vm11 = vcmp.ge.f32.partialorder %v1199_v22, 0.0  ;;  %v1219_v20 = vmul.f32 0.2, %v1199_v22  ;;  %v3124_v9 = vmul.f32 0.25, %v3108_v15  ;;  %v3123_v39 = vmul.f32 0.25, %v3107_v19  ;;  %4245 = vmatmul.mubr.msk.f32.gmra.mrb[14].mxu1 %vm1232_vm1, %v5760_v18 }
 0x207   : > { %v1167_v36 = vrot.slane %v1140_v16, 1  ;;  %v3066_v40 = vpop.permute.xlu1 %3065  ;;  %v3064_v41 = vpop.permute.xlu0 %3063  ;;  %4326 = vmatmul.mubr.msk.f32.gmra.mrb[60].mxu0 %vm1232_vm1, %v5760_v18 }
 0x208   : > { %v1229_v47 = vsel %vm1209_vm11, %v1199_v22, %v1219_v20  ;;  %v3110_v29 = vadd.f32 %v3066_v40, %v5480_v42  ;;  %v3109_v63 = vadd.f32 %v3064_v41, %v5466_v38  ;;  %v4232_v51 = vpop.f32.mrb[50].mxu0  ;;  %3158 = vrot.lane.b32.xlu1 %v3124_v9, %s4956_s16  ;;  %3156 = vrot.lane.b32.xlu0 %v3123_v39, %s4956_s16  ;;  %v5782_v33 = vld [vmem:[#allocation2 + $0x50] sm:$0xff] }
 0x209   : > { %1240 = vst.msk [vmem:[#allocation2 + $0x70] sm:$0xff] %vm1232_vm1, %v1229_v47  ;;  %v1190_v26 = vsel %vm1181_vm2, %v1167_v36, %v1177_v35  ;;  %v1178_v56 = vrot.slane %v4232_v51, 1  ;;  %v1150_v12 = vpop.f32.mrb[51].mxu0  ;;  %4247 = vmatprep.mubr.msk.f32.mxu1 %vm1232_vm1, %v5782_v33  ;;  %4328 = vmatprep.mubr.msk.f32.mxu0 %vm1232_vm1, %v5782_v33  ;;  %v5841_v36 = vld [vmem:[#allocation2 + $0x88] sm:$0xff] }
 0x20a   : > { %v1200_v38 = vadd.f32 %v1190_v26, %v5643_v25  ;;  %v3126_v42 = vmul.f32 0.25, %v3110_v29  ;;  %v3125_v32 = vmul.f32 0.25, %v3109_v63  ;;  %v1168_v60 = vrot.slane %v1150_v12, 1  ;;  %4248 = vmatmul.mubr.msk.f32.gmra.mrb[16].mxu1 %vm1232_vm1, %v5776_v44  ;;  %v1965_v12 = vld [vmem:[#allocation9 + $0x28] sm:$0xff] }
 0x20b   : > { %v3070_v52 = vpop.permute.xlu1 %3069  ;;  %v3068_v4 = vpop.permute.xlu0 %3067  ;;  %4329 = vmatmul.mubr.msk.f32.gmra.mrb[62].mxu0 %vm1232_vm1, %v5776_v44 }
 0x20c   : > { %vm1210_vm12 = vcmp.ge.f32.partialorder %v1200_v38, 0.0  ;;  %v1220_v6 = vmul.f32 0.2, %v1200_v38  ;;  %v1191_v10 = vsel %vm1181_vm2, %v1168_v60, %v1178_v56  ;;  %v3112_v25 = vadd.f32 %v3070_v52, %v5494_v46  ;;  %3162 = vrot.lane.b32.xlu1 %v3126_v42, %s4956_s16  ;;  %3160 = vrot.lane.b32.xlu0 %v3125_v32, %s4956_s16  ;;  %v5803_v8 = vld [vmem:[#allocation2 + $0x60] sm:$0xff]  ;;  %v1282_v52 = vld [vmem:[#allocation9 + $0x10] sm:$0xff] }
 0x20d   : > { %v1201_v13 = vadd.f32 %v1191_v10, %v5651_v37  ;;  %v3111_v55 = vadd.f32 %v3068_v4, %v5489_v45  ;;  %4250 = vmatprep.mubr.msk.f32.mxu1 %vm1232_vm1, %v5803_v8  ;;  %4331 = vmatprep.mubr.msk.f32.mxu0 %vm1232_vm1, %v5803_v8  ;;  %v5816_v45 = vld [vmem:[#allocation2 + $0x78] sm:$0xff] }
 0x20e   : > { %v1230_v14 = vsel %vm1210_vm12, %v1200_v38, %v1220_v6  ;;  %v3128_v17 = vmul.f32 0.25, %v3112_v25  ;;  %4251 = vmatmul.mubr.msk.f32.gmra.mrb[18].mxu1 %vm1232_vm1, %v5796_v5  ;;  %v2274_v4 = vld [vmem:[#allocation9 + $0x30] sm:$0xff]  ;;  %v2632_v25 = vld [vmem:[#allocation9 + $0x40] sm:$0xff] }
 0x20f   : > { %1241 = vst.msk [vmem:[#allocation2 + $0x80] sm:$0xff] %vm1232_vm1, %v1230_v14  ;;  %vm1211_vm13 = vcmp.ge.f32.partialorder %v1201_v13, 0.0  ;;  %v1221_v46 = vmul.f32 0.2, %v1201_v13  ;;  %v3127_v11 = vmul.f32 0.25, %v3111_v55  ;;  %v3074_v22 = vpop.permute.xlu1 %3073  ;;  %v3072_v37 = vpop.permute.xlu0 %3071  ;;  %4332 = vmatmul.mubr.msk.f32.gmra.mrb[64].mxu0 %vm1232_vm1, %v5796_v5 }
 0x210   : > { %v3114_v15 = vadd.f32 %v3074_v22, %v5508_v50  ;;  %v3113_v19 = vadd.f32 %v3072_v37, %v5503_v49  ;;  %3166 = vrot.lane.b32.xlu1 %v3128_v17, %s4956_s16  ;;  %v5821_v31 = vld [vmem:[#allocation2 + $0x70] sm:$0xff] }
 0x211   : > { %v1231_v35 = vsel %vm1211_vm13, %v1201_v13, %v1221_v46  ;;  %3164 = vrot.lane.b32.xlu0 %v3127_v11, %s4956_s16  ;;  %4253 = vmatprep.mubr.msk.f32.mxu1 %vm1232_vm1, %v5821_v31 }
 0x212   : > { %1242 = vst.msk [vmem:[#allocation2 + $0x90] sm:$0xff] %vm1232_vm1, %v1231_v35  ;;  %v3130_v16 = vmul.f32 0.25, %v3114_v15  ;;  %v3129_v20 = vmul.f32 0.25, %v3113_v19  ;;  %4334 = vmatprep.mubr.msk.f32.mxu0 %vm1232_vm1, %v5821_v31  ;;  %4254 = vmatmul.mubr.msk.f32.gmra.mrb[20].mxu1 %vm1232_vm1, %v5816_v45  ;;  %v4957_v35 = vmov 0  }
 0x213   : > { %1260 = vst.msk [vmem:[#allocation2 + $0x90] sm:$0xff] %vm1232_vm1, %v4954_v3  ;;  %v3078_v49 = vpop.permute.xlu1 %3077  ;;  %v3076_v50 = vpop.permute.xlu0 %3075  ;;  %4335 = vmatmul.mubr.msk.f32.gmra.mrb[66].mxu0 %vm1232_vm1, %v5816_v45  ;;  %4710 = vset.pattern.permute.xlu0 %v4957_v35 }
 0x214   : > { %v3116_v9 = vadd.f32 %v3078_v49, %v5522_v54  ;;  %v3115_v39 = vadd.f32 %v3076_v50, %v5517_v53  ;;  %3170 = vrot.lane.b32.xlu1 %v3130_v16, %s4956_s16  ;;  %4417 = vmatprep.mubr.msk.f32.mxu0 %vm1232_vm1, %v5728_v59  ;;  %v3832_v16 = vld [vmem:[#allocation3] ss:$0 sm:$0xff] }
 0x215   : > { %3168 = vrot.lane.b32.xlu0 %v3129_v20, %s4956_s16 }
 0x216   : > { %v3132_v40 = vmul.f32 0.25, %v3116_v9  ;;  %v3131_v3 = vmul.f32 0.25, %v3115_v39  ;;  %v5843_v41 = vld [vmem:[#allocation2 + $0x80] sm:$0xff] }
 0x217   : > { %4256 = vmatprep.mubr.msk.f32.mxu1 %vm1232_vm1, %v5843_v41  ;;  %v3082_v47 = vpop.permute.xlu1 %3081  ;;  %v3080_v54 = vpop.permute.xlu0 %3079  ;;  %4418 = vmatmul.mubr.msk.f32.vlgmr.msra.gmra.mrb[68].mxu0 %vm1232_vm1, %v5723_v48 }
 0x218   : > { %4257 = vmatmul.mubr.msk.f32.gmra.mrb[22].mxu1 %vm1232_vm1, %v5841_v36  ;;  %v3118_v53 = vadd.f32 %v3082_v47, %v5536_v58  ;;  %v3117_v29 = vadd.f32 %v3080_v54, %v5531_v57  ;;  %3174 = vrot.lane.b32.xlu1 %v3132_v40, %s4956_s16 }
 0x219   : > { %3172 = vrot.lane.b32.xlu0 %v3131_v3, %s4956_s16  ;;  %4420 = vmatprep.mubr.msk.f32.mxu0 %vm1232_vm1, %v5747_v7 }
 0x21a   : > { %v3134_v63 = vmul.f32 0.25, %v3118_v53  ;;  %v3133_v51 = vmul.f32 0.25, %v3117_v29  ;;  %4261 = vmatprep.mubr.msk.f32.mxu1 %vm1232_vm1, %v5696_v30  ;;  %4468 = vmatpush3.msk.msra.mxu0 %vm3221_vm8, %v5725_v27 }
 0x21b   : > { %v3086_v26 = vpop.permute.xlu1 %3085  ;;  %v3084_v56 = vpop.permute.xlu0 %3083  ;;  %4421 = vmatmul.mubr.msk.f32.gmra.mrb[70].mxu0 %vm1232_vm1, %v5744_v0 }
 0x21c   : > { %4262 = vmatmul.mubr.msk.f32.vlgmr.msra.gmra.mrb[8].mxu1 %vm1232_vm1, %v5693_v28  ;;  %v3120_v57 = vadd.f32 %v3086_v26, %v5550_v62  ;;  %v3119_v58 = vadd.f32 %v3084_v56, %v5545_v61  ;;  %3178 = vrot.lane.b32.xlu1 %v3134_v63, %s4956_s16 }
 0x21d   : > { %4264 = vmatprep.mubr.msk.f32.mxu1 %vm1232_vm1, %v5706_v43  ;;  %4286 = vmatpush3.msra.mxu1 %v5714_v21 }
 0x21e   : > { %v3136_v27 = vmul.f32 0.25, %v3120_v57  ;;  %v3135_v38 = vmul.f32 0.25, %v3119_v58  ;;  %3176 = vrot.lane.b32.xlu0 %v3133_v51, %s4956_s16  ;;  %4423 = vmatprep.mubr.msk.f32.mxu0 %vm1232_vm1, %v5765_v34 }
 0x21f   : > { %v3090_v42 = vpop.permute.xlu1 %3089  ;;  %v3088_v32 = vpop.permute.xlu0 %3087  ;;  %4424 = vmatmul.mubr.msk.f32.gmra.mrb[72].mxu0 %vm1232_vm1, %v5760_v18  ;;  %4337 = vmatprep.subr.mxu1 %v1965_v12 }
 0x220   : > { %4265 = vmatmul.mubr.msk.f32.gmra.mrb[10].mxu1 %vm1232_vm1, %v5704_v24  ;;  %v3122_v61 = vadd.f32 %v3090_v42, %v5564_v2  ;;  %v3121_v62 = vadd.f32 %v3088_v32, %v5559_v1  ;;  %3182 = vrot.lane.b32.xlu1 %v3136_v27, %s4956_s16  ;;  %v5912_v1 = vld [vmem:[#allocation2 + $0x90] sm:$0xff]  ;;  %v5920_v2 = vld [vmem:[#allocation2 + $0x98] sm:$0xff] }
 0x221   : > { %4267 = vmatprep.mubr.msk.f32.mxu1 %vm1232_vm1, %v5728_v59  ;;  %4426 = vmatprep.mubr.msk.f32.mxu0 %vm1232_vm1, %v5782_v33 }
 0x222   : > { %v3138_v21 = vmul.f32 0.25, %v3122_v61  ;;  %v3137_v60 = vmul.f32 0.25, %v3121_v62  ;;  %3180 = vrot.lane.b32.xlu0 %v3135_v38, %s4956_s16 }
 0x223   : > { %4427 = vmatmul.mubr.msk.f32.gmra.mrb[74].mxu0 %vm1232_vm1, %v5776_v44 }
 0x224   : > { %4268 = vmatmul.mubr.msk.f32.gmra.mrb[12].mxu1 %vm1232_vm1, %v5723_v48  ;;  %3186 = vrot.lane.b32.xlu1 %v3138_v21, %s4956_s16 }
 0x225   : > { %4270 = vmatprep.mubr.msk.f32.mxu1 %vm1232_vm1, %v5747_v7  ;;  %4429 = vmatprep.mubr.msk.f32.mxu0 %vm1232_vm1, %v5803_v8 }
 0x226   : > { %3184 = vrot.lane.b32.xlu0 %v3137_v60, %s4956_s16 }
 0x227   : > { %4430 = vmatmul.mubr.msk.f32.gmra.mrb[76].mxu0 %vm1232_vm1, %v5796_v5 }
 0x228   : > { %4271 = vmatmul.mubr.msk.f32.gmra.mrb[14].mxu1 %vm1232_vm1, %v5744_v0  ;;  %4432 = vmatprep.mubr.msk.f32.mxu0 %vm1232_vm1, %v5821_v31 }
 0x229   : > { %4273 = vmatprep.mubr.msk.f32.mxu1 %vm1232_vm1, %v5765_v34 }
 0x22a   : > { %3384 = vperm.xlu0 %4710, %v3832_v16  }
 0x22b   : > { %4433 = vmatmul.mubr.msk.f32.gmra.mrb[78].mxu0 %vm1232_vm1, %v5816_v45 }
 0x22c   : > { %4274 = vmatmul.mubr.msk.f32.gmra.mrb[16].mxu1 %vm1232_vm1, %v5760_v18  ;;  %4435 = vmatprep.mubr.msk.f32.mxu0 %vm1232_vm1, %v5843_v41 }
 0x22d   : > { %4276 = vmatprep.mubr.msk.f32.mxu1 %vm1232_vm1, %v5782_v33 }
 0x22f   : > { %4436 = vmatmul.mubr.msk.f32.gmra.mrb[80].mxu0 %vm1232_vm1, %v5841_v36 }
 0x230   : > { %4277 = vmatmul.mubr.msk.f32.gmra.mrb[18].mxu1 %vm1232_vm1, %v5776_v44  ;;  %4438 = vmatprep.mubr.msk.f32.mxu0 %vm1232_vm1, %v5912_v1 }
 0x231   : > { %4279 = vmatprep.mubr.msk.f32.mxu1 %vm1232_vm1, %v5803_v8 }
 0x233   : > { %4439 = vmatmul.mubr.msk.f32.gmra.mrb[82].mxu0 %vm1232_vm1, %v5920_v2 }
 0x234   : > { %4280 = vmatmul.mubr.msk.f32.gmra.mrb[20].mxu1 %vm1232_vm1, %v5796_v5 }
 0x235   : > { %4282 = vmatprep.mubr.msk.f32.mxu1 %vm1232_vm1, %v5821_v31 }
 0x238   : > { %4283 = vmatmul.mubr.msk.f32.gmra.mrb[22].mxu1 %vm1232_vm1, %v5816_v45 }
 0x239   : > { %4287 = vmatprep.mubr.msk.f32.mxu1 %vm1232_vm1, %v5706_v43 }
 0x23c   : > { %4288 = vmatmul.mubr.msk.f32.vlgmr.msra.gmra.mrb[24].mxu1 %vm1232_vm1, %v5704_v24 }
 0x23d   : > { %4290 = vmatprep.mubr.msk.f32.mxu1 %vm1232_vm1, %v5728_v59  ;;  %4338 = vmatpush3.msra.mxu1 %v1965_v12 }
 0x23e   : > { %4363 = vmatprep.subr.mxu1 %v1282_v52 }
 0x240   : > { %4291 = vmatmul.mubr.msk.f32.gmra.mrb[26].mxu1 %vm1232_vm1, %v5723_v48 }
 0x241   : > { %4293 = vmatprep.mubr.msk.f32.mxu1 %vm1232_vm1, %v5747_v7 }
 0x244   : > { %4294 = vmatmul.mubr.msk.f32.gmra.mrb[28].mxu1 %vm1232_vm1, %v5744_v0 }
 0x245   : > { %4296 = vmatprep.mubr.msk.f32.mxu1 %vm1232_vm1, %v5765_v34 }
 0x248   : > { %4297 = vmatmul.mubr.msk.f32.gmra.mrb[30].mxu1 %vm1232_vm1, %v5760_v18 }
 0x249   : > { %4299 = vmatprep.mubr.msk.f32.mxu1 %vm1232_vm1, %v5782_v33 }
 0x24c   : > { %4300 = vmatmul.mubr.msk.f32.gmra.mrb[32].mxu1 %vm1232_vm1, %v5776_v44 }
 0x24d   : > { %4302 = vmatprep.mubr.msk.f32.mxu1 %vm1232_vm1, %v5803_v8 }
 0x250   : > { %4303 = vmatmul.mubr.msk.f32.gmra.mrb[34].mxu1 %vm1232_vm1, %v5796_v5 }
 0x251   : > { %4305 = vmatprep.mubr.msk.f32.mxu1 %vm1232_vm1, %v5821_v31 }
 0x254   : > { %4306 = vmatmul.mubr.msk.f32.gmra.mrb[36].mxu1 %vm1232_vm1, %v5816_v45 }
 0x255   : > { %4308 = vmatprep.mubr.msk.f32.mxu1 %vm1232_vm1, %v5843_v41 }
 0x258   : > { %4309 = vmatmul.mubr.msk.f32.gmra.mrb[38].mxu1 %vm1232_vm1, %v5841_v36 }
 0x259   : > { %4339 = vmatprep.mubr.msk.f32.mxu1 %vm1232_vm1, %v5706_v43 }
 0x25c   : > { %4340 = vmatmul.mubr.msk.f32.vlgmr.msra.gmra.mrb[40].mxu1 %vm1232_vm1, %v5704_v24 }
 0x25d   : > { %4342 = vmatprep.mubr.msk.f32.mxu1 %vm1232_vm1, %v5728_v59  ;;  %4364 = vmatpush3.msra.mxu1 %v1282_v52 }
 0x25e   : > { %4389 = vmatprep.subr.mxu1 %v2274_v4 }
 0x260   : > { %4343 = vmatmul.mubr.msk.f32.gmra.mrb[42].mxu1 %vm1232_vm1, %v5723_v48 }
 0x261   : > { %4345 = vmatprep.mubr.msk.f32.mxu1 %vm1232_vm1, %v5747_v7 }
 0x264   : > { %4346 = vmatmul.mubr.msk.f32.gmra.mrb[44].mxu1 %vm1232_vm1, %v5744_v0 }
 0x265   : > { %4348 = vmatprep.mubr.msk.f32.mxu1 %vm1232_vm1, %v5765_v34 }
 0x268   : > { %4349 = vmatmul.mubr.msk.f32.gmra.mrb[46].mxu1 %vm1232_vm1, %v5760_v18 }
 0x269   : > { %4351 = vmatprep.mubr.msk.f32.mxu1 %vm1232_vm1, %v5782_v33 }
 0x26c   : > { %4352 = vmatmul.mubr.msk.f32.gmra.mrb[48].mxu1 %vm1232_vm1, %v5776_v44 }
 0x26d   : > { %4354 = vmatprep.mubr.msk.f32.mxu1 %vm1232_vm1, %v5803_v8 }
 0x270   : > { %4355 = vmatmul.mubr.msk.f32.gmra.mrb[50].mxu1 %vm1232_vm1, %v5796_v5 }
 0x271   : > { %4357 = vmatprep.mubr.msk.f32.mxu1 %vm1232_vm1, %v5821_v31 }
 0x274   : > { %4358 = vmatmul.mubr.msk.f32.gmra.mrb[52].mxu1 %vm1232_vm1, %v5816_v45 }
 0x275   : > { %4360 = vmatprep.mubr.msk.f32.mxu1 %vm1232_vm1, %v5843_v41 }
 0x278   : > { %4361 = vmatmul.mubr.msk.f32.gmra.mrb[54].mxu1 %vm1232_vm1, %v5841_v36 }
 0x279   : > { %4365 = vmatprep.mubr.msk.f32.mxu1 %vm1232_vm1, %v5696_v30 }
 0x27a   : > { %v3159_v6 = vpop.permute.xlu1 %3158  ;;  %v3157_v10 = vpop.permute.xlu0 %3156 }
 0x27b   : > { %4469 = vmatprep.mubr.msk.f32.mxu0 %vm3188_vm14, %v3157_v10 }
 0x27c   : > { %4366 = vmatmul.mubr.msk.f32.vlgmr.msra.gmra.mrb[40].mxu1 %vm1232_vm1, %v5693_v28  ;;  %4470 = vmatmul.mubr.msk.f32.vlgmr.msra.gmra.mrb[84].mxu0 %vm3188_vm14, %v3159_v6 }
 0x27d   : > { %4368 = vmatprep.mubr.msk.f32.mxu1 %vm1232_vm1, %v5706_v43  ;;  %4390 = vmatpush3.msra.mxu1 %v2274_v4 }
 0x27e   : > { %v3163_v13 = vpop.permute.xlu1 %3162  ;;  %v3161_v55 = vpop.permute.xlu0 %3160  ;;  %4441 = vmatprep.subr.mxu1 %v2632_v25 }
 0x27f   : > { %4472 = vmatprep.mubr.msk.f32.mxu0 %vm3188_vm14, %v3161_v55 }
 0x280   : > { %4369 = vmatmul.mubr.msk.f32.gmra.mrb[42].mxu1 %vm1232_vm1, %v5704_v24  ;;  %4473 = vmatmul.mubr.msk.f32.gmra.mrb[86].mxu0 %vm3188_vm14, %v3163_v13 }
 0x281   : > { %4371 = vmatprep.mubr.msk.f32.mxu1 %vm1232_vm1, %v5728_v59 }
 0x282   : > { %v3167_v28 = vpop.permute.xlu1 %3166 }
 0x283   : > { %v3165_v30 = vpop.permute.xlu0 %3164 }
 0x284   : > { %4372 = vmatmul.mubr.msk.f32.gmra.mrb[44].mxu1 %vm1232_vm1, %v5723_v48  ;;  %4475 = vmatprep.mubr.msk.f32.mxu0 %vm3188_vm14, %v3165_v30 }
 0x285   : > { %4374 = vmatprep.mubr.msk.f32.mxu1 %vm1232_vm1, %v5747_v7  ;;  %4476 = vmatmul.mubr.msk.f32.gmra.mrb[88].mxu0 %vm3188_vm14, %v3167_v28 }
 0x286   : > { %v3171_v43 = vpop.permute.xlu1 %3170 }
 0x287   : > { %v3169_v14 = vpop.permute.xlu0 %3168 }
 0x288   : > { %4375 = vmatmul.mubr.msk.f32.gmra.mrb[46].mxu1 %vm1232_vm1, %v5744_v0  ;;  %4478 = vmatprep.mubr.msk.f32.mxu0 %vm3188_vm14, %v3169_v14 }
 0x289   : > { %4377 = vmatprep.mubr.msk.f32.mxu1 %vm1232_vm1, %v5765_v34  ;;  %4479 = vmatmul.mubr.msk.f32.gmra.mrb[90].mxu0 %vm3188_vm14, %v3171_v43 }
 0x28a   : > { %v3175_v24 = vpop.permute.xlu1 %3174 }
 0x28b   : > { %v3173_v17 = vpop.permute.xlu0 %3172 }
 0x28c   : > { %4378 = vmatmul.mubr.msk.f32.gmra.mrb[48].mxu1 %vm1232_vm1, %v5760_v18  ;;  %4481 = vmatprep.mubr.msk.f32.mxu0 %vm3188_vm14, %v3173_v17 }
 0x28d   : > { %4380 = vmatprep.mubr.msk.f32.mxu1 %vm1232_vm1, %v5782_v33  ;;  %4482 = vmatmul.mubr.msk.f32.gmra.mrb[92].mxu0 %vm3188_vm14, %v3175_v24 }
 0x28e   : > { %v3179_v46 = vpop.permute.xlu1 %3178 }
 0x290   : > { %v3177_v11 = vpop.permute.xlu0 %3176  ;;  %4381 = vmatmul.mubr.msk.f32.gmra.mrb[50].mxu1 %vm1232_vm1, %v5776_v44 }
 0x291   : > { %4383 = vmatprep.mubr.msk.f32.mxu1 %vm1232_vm1, %v5803_v8  ;;  %4484 = vmatprep.mubr.msk.f32.mxu0 %vm3188_vm14, %v3177_v11 }
 0x292   : > { %4485 = vmatmul.mubr.msk.f32.gmra.mrb[94].mxu0 %vm3188_vm14, %v3179_v46  ;;  %v3183_v22 = vpop.permute.xlu1 %3182 }
 0x294   : > { %v3181_v37 = vpop.permute.xlu0 %3180  ;;  %4384 = vmatmul.mubr.msk.f32.gmra.mrb[52].mxu1 %vm1232_vm1, %v5796_v5 }
 0x295   : > { %4386 = vmatprep.mubr.msk.f32.mxu1 %vm1232_vm1, %v5821_v31  ;;  %4487 = vmatprep.mubr.msk.f32.mxu0 %vm3188_vm14, %v3181_v37 }
 0x296   : > { %4488 = vmatmul.mubr.msk.f32.gmra.mrb[96].mxu0 %vm3188_vm14, %v3183_v22  ;;  %v3187_v15 = vpop.permute.xlu1 %3186 }
 0x298   : > { %v3185_v19 = vpop.permute.xlu0 %3184  ;;  %4387 = vmatmul.mubr.msk.f32.gmra.mrb[54].mxu1 %vm1232_vm1, %v5816_v45 }
 0x299   : > { %4391 = vmatprep.mubr.msk.f32.mxu1 %vm1232_vm1, %v5728_v59  ;;  %4490 = vmatprep.mubr.msk.f32.mxu0 %vm3188_vm14, %v3185_v19 }
 0x29a   : > { %4491 = vmatmul.mubr.msk.f32.gmra.mrb[98].mxu0 %vm3188_vm14, %v3187_v15 }
 0x29c   : > { %4392 = vmatmul.mubr.msk.f32.vlgmr.msra.gmra.mrb[8].mxu1 %vm1232_vm1, %v5723_v48 }
 0x29d   : > { %4394 = vmatprep.mubr.msk.f32.mxu1 %vm1232_vm1, %v5747_v7  ;;  %4442 = vmatpush3.msra.mxu1 %v2632_v25 }
 0x2a0   : > { %4395 = vmatmul.mubr.msk.f32.gmra.mrb[10].mxu1 %vm1232_vm1, %v5744_v0 }
 0x2a1   : > { %4397 = vmatprep.mubr.msk.f32.mxu1 %vm1232_vm1, %v5765_v34 }
 0x2a4   : > { %4398 = vmatmul.mubr.msk.f32.gmra.mrb[12].mxu1 %vm1232_vm1, %v5760_v18 }
 0x2a5   : > { %4400 = vmatprep.mubr.msk.f32.mxu1 %vm1232_vm1, %v5782_v33 }
 0x2a8   : > { %4401 = vmatmul.mubr.msk.f32.gmra.mrb[14].mxu1 %vm1232_vm1, %v5776_v44 }
 0x2a9   : > { %4403 = vmatprep.mubr.msk.f32.mxu1 %vm1232_vm1, %v5803_v8 }
 0x2ac   : > { %4404 = vmatmul.mubr.msk.f32.gmra.mrb[16].mxu1 %vm1232_vm1, %v5796_v5 }
 0x2ad   : > { %4406 = vmatprep.mubr.msk.f32.mxu1 %vm1232_vm1, %v5821_v31 }
 0x2b0   : > { %4407 = vmatmul.mubr.msk.f32.gmra.mrb[18].mxu1 %vm1232_vm1, %v5816_v45 }
 0x2b1   : > { %4409 = vmatprep.mubr.msk.f32.mxu1 %vm1232_vm1, %v5843_v41 }
 0x2b4   : > { %4410 = vmatmul.mubr.msk.f32.gmra.mrb[20].mxu1 %vm1232_vm1, %v5841_v36 }
 0x2b5   : > { %4412 = vmatprep.mubr.msk.f32.mxu1 %vm1232_vm1, %v5912_v1 }
 0x2b8   : > { %4413 = vmatmul.mubr.msk.f32.gmra.mrb[22].mxu1 %vm1232_vm1, %v5920_v2 }
 0x2b9   : > { %4443 = vmatprep.mubr.msk.f32.mxu1 %vm1232_vm1, %v5728_v59 }
 0x2bc   : > { %4444 = vmatmul.mubr.msk.f32.vlgmr.msra.gmra.mrb[40].mxu1 %vm1232_vm1, %v5723_v48 }
 0x2bd   : > { %4446 = vmatprep.mubr.msk.f32.mxu1 %vm1232_vm1, %v5747_v7 }
 0x2c0   : > { %4447 = vmatmul.mubr.msk.f32.gmra.mrb[42].mxu1 %vm1232_vm1, %v5744_v0 }
 0x2c1   : > { %4449 = vmatprep.mubr.msk.f32.mxu1 %vm1232_vm1, %v5765_v34 }
 0x2c4   : > { %4450 = vmatmul.mubr.msk.f32.gmra.mrb[44].mxu1 %vm1232_vm1, %v5760_v18 }
 0x2c5   : > { %4452 = vmatprep.mubr.msk.f32.mxu1 %vm1232_vm1, %v5782_v33 }
 0x2c8   : > { %4453 = vmatmul.mubr.msk.f32.gmra.mrb[46].mxu1 %vm1232_vm1, %v5776_v44 }
 0x2c9   : > { %4455 = vmatprep.mubr.msk.f32.mxu1 %vm1232_vm1, %v5803_v8 }
 0x2ca   : > { %v4315_v48 = vpop.f32.mrb[52].mxu0 }
 0x2cb   : > { %v1893_v59 = vpop.f32.mrb[53].mxu0 }
 0x2cc   : > { %4456 = vmatmul.mubr.msk.f32.gmra.mrb[48].mxu1 %vm1232_vm1, %v5796_v5 }
 0x2cd   : > { %4458 = vmatprep.mubr.msk.f32.mxu1 %vm1232_vm1, %v5821_v31 }
 0x2ce   : > { %v4318_v0 = vpop.f32.mrb[54].mxu0 }
 0x2cf   : > { %v1902_v7 = vpop.f32.mrb[55].mxu0 }
 0x2d0   : > { %4459 = vmatmul.mubr.msk.f32.gmra.mrb[50].mxu1 %vm1232_vm1, %v5816_v45 }
 0x2d1   : > { %4461 = vmatprep.mubr.msk.f32.mxu1 %vm1232_vm1, %v5843_v41 }
 0x2d2   : > { %v4321_v18 = vpop.f32.mrb[56].mxu0 }
 0x2d3   : > { %v1911_v34 = vpop.f32.mrb[57].mxu0 }
 0x2d4   : > { %4462 = vmatmul.mubr.msk.f32.gmra.mrb[52].mxu1 %vm1232_vm1, %v5841_v36 }
 0x2d5   : > { %4464 = vmatprep.mubr.msk.f32.mxu1 %vm1232_vm1, %v5912_v1 }
 0x2d6   : > { %v4324_v44 = vpop.f32.mrb[58].mxu0 }
 0x2d7   : > { %v1920_v33 = vpop.f32.mrb[59].mxu0 }
 0x2d8   : > { %4465 = vmatmul.mubr.msk.f32.gmra.mrb[54].mxu1 %vm1232_vm1, %v5920_v2 }
 0x2da   : > { %v4327_v5 = vpop.f32.mrb[60].mxu0 }
 0x2db   : > { %v1929_v8 = vpop.f32.mrb[61].mxu0 }
 0x2de   : > { %v4330_v31 = vpop.f32.mrb[62].mxu0 }
 0x2df   : > { %v1938_v45 = vpop.f32.mrb[63].mxu0 }
 0x2e2   : > { %v4333_v20 = vpop.f32.mrb[64].mxu0 }
 0x2e3   : > { %v1947_v49 = vpop.f32.mrb[65].mxu0 }
 0x2e6   : > { %v4336_v50 = vpop.f32.mrb[66].mxu0 }
 0x2e7   : > { %v1956_v9 = vpop.f32.mrb[67].mxu0 }
 0x2ea   : > { %v4419_v39 = vpop.f32.mrb[68].mxu0 }
 0x2eb   : > { %v2552_v40 = vpop.f32.mrb[69].mxu0 }
 0x2ee   : > { %v4422_v3 = vpop.f32.mrb[70].mxu0 }
 0x2ef   : > { %v2561_v36 = vpop.f32.mrb[71].mxu0 }
 0x2f2   : > { %v4425_v41 = vpop.f32.mrb[72].mxu0 }
 0x2f3   : > { %v2570_v47 = vpop.f32.mrb[73].mxu0 }
 0x2f6   : > { %v4428_v54 = vpop.f32.mrb[74].mxu0 }
 0x2f7   : > { %v2579_v53 = vpop.f32.mrb[75].mxu0 }
 0x2fa   : > { %v4431_v29 = vpop.f32.mrb[76].mxu0 }
 0x2fb   : > { %v2588_v63 = vpop.f32.mrb[77].mxu0 }
 0x2fe   : > { %v4434_v51 = vpop.f32.mrb[78].mxu0 }
 0x2ff   : > { %v2597_v26 = vpop.f32.mrb[79].mxu0 }
 0x302   : > { %v4437_v56 = vpop.f32.mrb[80].mxu0 }
 0x303   : > { %v2606_v57 = vpop.f32.mrb[81].mxu0 }
 0x306   : > { %v4440_v58 = vpop.f32.mrb[82].mxu0 }
 0x307   : > { %v2615_v12 = vpop.f32.mrb[83].mxu0 }
 0x30f   : > { %v4289_v27 = vpop.f32.mrb[24].mxu1 }
 0x310   : > { %v1756_v38 = vpop.f32.mrb[25].mxu1 }
 0x311   : > { %v1894_v42 = vadd.f32 %v1893_v59, %v1756_v38 }
 0x313   : > { %v2623_v32 = vadd.f32 %v2552_v40, %v1894_v42  ;;  %v4292_v61 = vpop.f32.mrb[26].mxu1 }
 0x314   : > { %v1765_v62 = vpop.f32.mrb[27].mxu1 }
 0x315   : > { %v1903_v21 = vadd.f32 %v1902_v7, %v1765_v62 }
 0x317   : > { %v2624_v60 = vadd.f32 %v2561_v36, %v1903_v21  ;;  %v4295_v1 = vpop.f32.mrb[28].mxu1 }
 0x318   : > { %v1774_v2 = vpop.f32.mrb[29].mxu1 }
 0x319   : > { %v1912_v52 = vadd.f32 %v1911_v34, %v1774_v2 }
 0x31b   : > { %v2625_v4 = vadd.f32 %v2570_v47, %v1912_v52  ;;  %v4298_v6 = vpop.f32.mrb[30].mxu1 }
 0x31c   : > { %v1783_v10 = vpop.f32.mrb[31].mxu1 }
 0x31d   : > { %v1921_v25 = vadd.f32 %v1920_v33, %v1783_v10 }
 0x31f   : > { %v2626_v13 = vadd.f32 %v2579_v53, %v1921_v25  ;;  %v4301_v55 = vpop.f32.mrb[32].mxu1 }
 0x320   : > { %v1792_v28 = vpop.f32.mrb[33].mxu1 }
 0x321   : > { %v1930_v30 = vadd.f32 %v1929_v8, %v1792_v28 }
 0x323   : > { %v2627_v43 = vadd.f32 %v2588_v63, %v1930_v30  ;;  %v4304_v14 = vpop.f32.mrb[34].mxu1 }
 0x324   : > { %v1801_v24 = vpop.f32.mrb[35].mxu1 }
 0x325   : > { %v1939_v17 = vadd.f32 %v1938_v45, %v1801_v24 }
 0x327   : > { %v2628_v46 = vadd.f32 %v2597_v26, %v1939_v17  ;;  %v4307_v11 = vpop.f32.mrb[36].mxu1 }
 0x328   : > { %v1810_v22 = vpop.f32.mrb[37].mxu1 }
 0x329   : > { %v1948_v37 = vadd.f32 %v1947_v49, %v1810_v22 }
 0x32b   : > { %v6108_v15 = vadd.f32 %v2606_v57, %v1948_v37  ;;  %v4310_v19 = vpop.f32.mrb[38].mxu1 }
 0x32c   : > { %v1819_v35 = vpop.f32.mrb[39].mxu1 }
 0x32d   : > { %v1957_v16 = vadd.f32 %v1956_v9, %v1819_v35 }
 0x32f   : > { %v6110_v48 = vadd.f32 %v2615_v12, %v1957_v16 }
 0x34f   : > { %v4471_v59 = vpop.f32.mrb[84].mxu0 }
 0x350   : > { %v6112_v0 = vpop.f32.mrb[85].mxu0 }
 0x353   : > { %v4474_v7 = vpop.f32.mrb[86].mxu0 }
 0x354   : > { %v6114_v18 = vpop.f32.mrb[87].mxu0 }
 0x358   : > { %v4477_v34 = vpop.f32.mrb[88].mxu0 }
 0x359   : > { %v6116_v44 = vpop.f32.mrb[89].mxu0 }
 0x35c   : > { %v4480_v33 = vpop.f32.mrb[90].mxu0 }
 0x35d   : > { %v6118_v5 = vpop.f32.mrb[91].mxu0 }
 0x360   : > { %v4483_v8 = vpop.f32.mrb[92].mxu0 }
 0x361   : > { %v6120_v31 = vpop.f32.mrb[93].mxu0 }
 0x365   : > { %v4486_v45 = vpop.f32.mrb[94].mxu0 }
 0x366   : > { %v6122_v20 = vpop.f32.mrb[95].mxu0 }
 0x369   : > { %v4489_v49 = vpop.f32.mrb[96].mxu0 }
 0x36a   : > { %v6124_v50 = vpop.f32.mrb[97].mxu0 }
 0x36d   : > { %v4492_v9 = vpop.f32.mrb[98].mxu0 }
 0x36e   : > { %v6126_v39 = vpop.f32.mrb[99].mxu0 }
 0x36f   : > { %v4393_v40 = vpop.f32.mrb[8].mxu1 }
 0x370   : > { %v2802_v3 = vrot.slane %v4393_v40, 7  ;;  %v2389_v36 = vpop.f32.mrb[9].mxu1 }
 0x371   : > { %v2794_v41 = vrot.slane %v2389_v36, 7 }
 0x373   : > { %v2811_v47 = vsel %vm2810_vm15, %v2802_v3, %v2794_v41  ;;  %v4396_v54 = vpop.f32.mrb[10].mxu1 }
 0x374   : > { %v2819_v53 = vadd.f32 %v2811_v47, %v2623_v32  ;;  %v2803_v29 = vrot.slane %v4396_v54, 7  ;;  %v2399_v63 = vpop.f32.mrb[11].mxu1  ;;  %v6159_v47 = vld [vmem:[#allocation12] ss:$0 sm:$0xff] }
 0x375   : > { %v2795_v51 = vrot.slane %v2399_v63, 7  ;;  %v3376_v23 = vadd.f32 %v6159_v47, %v6126_v39 }
 0x377   : > { %v2812_v26 = vsel %vm2810_vm15, %v2803_v29, %v2795_v51  ;;  %v4399_v56 = vpop.f32.mrb[12].mxu1  ;;  %v6161_v29 = vpop.permute.xlu0 %3384 }
 0x378   : > { %v2820_v57 = vadd.f32 %v2812_v26, %v2624_v60  ;;  %v2804_v58 = vrot.slane %v4399_v56, 7  ;;  %v2409_v12 = vpop.f32.mrb[13].mxu1 }
 0x379   : > { %v2796_v27 = vrot.slane %v2409_v12, 7 }
 0x37b   : > { %v2813_v38 = vsel %vm2810_vm15, %v2804_v58, %v2796_v27  ;;  %v4402_v42 = vpop.f32.mrb[14].mxu1 }
 0x37c   : > { %v2821_v61 = vadd.f32 %v2813_v38, %v2625_v4  ;;  %v2805_v62 = vrot.slane %v4402_v42, 7  ;;  %v2419_v21 = vpop.f32.mrb[15].mxu1 }
 0x37d   : > { %v2797_v1 = vrot.slane %v2419_v21, 7 }
 0x37f   : > { %v2814_v32 = vsel %vm2810_vm15, %v2805_v62, %v2797_v1  ;;  %v4405_v2 = vpop.f32.mrb[16].mxu1 }
 0x380   : > { %v6137_v52 = vadd.f32 %v2814_v32, %v2626_v13  ;;  %v2806_v6 = vrot.slane %v4405_v2, 7  ;;  %v2429_v10 = vpop.f32.mrb[17].mxu1 }
 0x381   : > { %v2798_v60 = vrot.slane %v2429_v10, 7 }
 0x383   : > { %v2815_v25 = vsel %vm2810_vm15, %v2806_v6, %v2798_v60  ;;  %v4408_v55 = vpop.f32.mrb[18].mxu1 }
 0x384   : > { %v6141_v28 = vadd.f32 %v2815_v25, %v2627_v43  ;;  %v2807_v30 = vrot.slane %v4408_v55, 7  ;;  %v2439_v4 = vpop.f32.mrb[19].mxu1 }
 0x385   : > { %v2799_v14 = vrot.slane %v2439_v4, 7 }
 0x387   : > { %v2816_v24 = vsel %vm2810_vm15, %v2807_v30, %v2799_v14  ;;  %v4411_v17 = vpop.f32.mrb[20].mxu1 }
 0x388   : > { %v6145_v11 = vadd.f32 %v2816_v24, %v2628_v46  ;;  %v2808_v13 = vrot.slane %v4411_v17, 7  ;;  %v2449_v22 = vpop.f32.mrb[21].mxu1  ;;  %v3371_v24 = vadd.f32 %v6159_v47, %v6116_v44  ;;  %v3372_v44 = vadd.f32 %v6159_v47, %v6118_v5 }
 0x389   : > { %v2800_v37 = vrot.slane %v2449_v22, 7  ;;  %v3373_v5 = vadd.f32 %v6159_v47, %v6120_v31  ;;  %v3374_v31 = vadd.f32 %v6159_v47, %v6122_v20  ;;  %v3375_v20 = vadd.f32 %v6159_v47, %v6124_v50 }
 0x38b   : > { %v2817_v19 = vsel %vm2810_vm15, %v2808_v13, %v2800_v37  ;;  %v4414_v35 = vpop.f32.mrb[22].mxu1 }
 0x38c   : > { %v6150_v16 = vadd.f32 %v2817_v19, %v6108_v15  ;;  %v2809_v43 = vrot.slane %v4414_v35, 7  ;;  %v2459_v59 = vpop.f32.mrb[23].mxu1 }
 0x38d   : > { %v2801_v7 = vrot.slane %v2459_v59, 7 }
 0x38f   : > { %v2818_v34 = vsel %vm2810_vm15, %v2809_v43, %v2801_v7  ;;  %v4445_v33 = vpop.f32.mrb[40].mxu1 }
 0x390   : > { %v6155_v46 = vadd.f32 %v2818_v34, %v6110_v48  ;;  %v2835_v8 = vrot.slane %v4445_v33, 1  ;;  %v2699_v45 = vpop.f32.mrb[41].mxu1 }
 0x391   : > { %v2827_v49 = vrot.slane %v2699_v45, 1 }
 0x393   : > { %v2843_v9 = vsel %vm1181_vm2, %v2827_v49, %v2835_v8  ;;  %v4448_v40 = vpop.f32.mrb[42].mxu1 }
 0x394   : > { %v2851_v15 = vadd.f32 %v2843_v9, %v2819_v53  ;;  %v2836_v3 = vrot.slane %v4448_v40, 1  ;;  %v2709_v36 = vpop.f32.mrb[43].mxu1  ;;  %v3369_v53 = vadd.f32 %v6159_v47, %v6112_v0 }
 0x395   : > { %v2828_v41 = vrot.slane %v2709_v36, 1 }
 0x396   : > { %vm2859_vm0 = vcmp.ge.f32.partialorder %v2851_v15, 0.0  ;;  %v2867_v54 = vmul.f32 0.2, %v2851_v15 }
 0x397   : > { %v2844_v48 = vsel %vm1181_vm2, %v2828_v41, %v2836_v3  ;;  %v4451_v63 = vpop.f32.mrb[44].mxu1 }
 0x398   : > { %v2875_v51 = vsel %vm2859_vm0, %v2851_v15, %v2867_v54  ;;  %v2852_v26 = vadd.f32 %v2844_v48, %v2820_v57  ;;  %v2837_v56 = vrot.slane %v4451_v63, 1  ;;  %v2719_v58 = vpop.f32.mrb[45].mxu1  ;;  %v3370_v57 = vadd.f32 %v6159_v47, %v6114_v18 }
 0x399   : > { %v3387_v12 = vmul.f32 %v6161_v29, %v2875_v51  ;;  %v2829_v27 = vrot.slane %v2719_v58, 1 }
 0x39a   : > { %vm2860_vm3 = vcmp.ge.f32.partialorder %v2852_v26, 0.0  ;;  %v2868_v38 = vmul.f32 0.2, %v2852_v26 }
 0x39b   : > { %v3395_v42 = vadd.f32 %v3387_v12, %v3369_v53  ;;  %v2845_v62 = vsel %vm1181_vm2, %v2829_v27, %v2837_v56  ;;  %v4454_v21 = vpop.f32.mrb[46].mxu1 }
 0x39c   : > { %v2876_v1 = vsel %vm2860_vm3, %v2852_v26, %v2868_v38  ;;  %v2853_v32 = vadd.f32 %v2845_v62, %v2821_v61  ;;  %v2838_v2 = vrot.slane %v4454_v21, 1  ;;  %v2729_v6 = vpop.f32.mrb[47].mxu1 }
 0x39d   : > { %v3388_v10 = vmul.f32 %v6161_v29, %v2876_v1  ;;  %3403 = vst.msk [vmem:[%s6174_s29] sm:$0xff] %vm1232_vm1, %v3395_v42  ;;  %v2830_v0 = vrot.slane %v2729_v6, 1 }
 0x39e   : > { %vm2861_vm4 = vcmp.ge.f32.partialorder %v2853_v32, 0.0  ;;  %v2869_v60 = vmul.f32 0.2, %v2853_v32 }
 0x39f   : > { %v3396_v25 = vadd.f32 %v3388_v10, %v3370_v57  ;;  %v2846_v61 = vsel %vm1181_vm2, %v2830_v0, %v2838_v2  ;;  %v4457_v55 = vpop.f32.mrb[48].mxu1 }
 0x3a0   : > { %v2877_v30 = vsel %vm2861_vm4, %v2853_v32, %v2869_v60  ;;  %v2854_v4 = vadd.f32 %v2846_v61, %v6137_v52  ;;  %v2839_v18 = vrot.slane %v4457_v55, 1  ;;  %v2739_v14 = vpop.f32.mrb[49].mxu1 }
 0x3a1   : > { %3404 = vst.msk [vmem:[%s6174_s29 + $0x8] sm:$0xff] %vm1232_vm1, %v3396_v25  ;;  %v3389_v17 = vmul.f32 %v6161_v29, %v2877_v30  ;;  %v2831_v13 = vrot.slane %v2739_v14, 1 }
 0x3a2   : > { %vm2862_vm5 = vcmp.ge.f32.partialorder %v2854_v4, 0.0  ;;  %v2870_v22 = vmul.f32 0.2, %v2854_v4 }
 0x3a3   : > { %v3397_v37 = vadd.f32 %v3389_v17, %v3371_v24  ;;  %v2847_v19 = vsel %vm1181_vm2, %v2831_v13, %v2839_v18  ;;  %v4460_v35 = vpop.f32.mrb[50].mxu1 }
 0x3a4   : > { %v2878_v43 = vsel %vm2862_vm5, %v2854_v4, %v2870_v22  ;;  %v2855_v52 = vadd.f32 %v2847_v19, %v6141_v28  ;;  %v2840_v59 = vrot.slane %v4460_v35, 1  ;;  %v2749_v7 = vpop.f32.mrb[51].mxu1 }
 0x3a5   : > { %3405 = vst.msk [vmem:[%s6174_s29 + $0x10] sm:$0xff] %vm1232_vm1, %v3397_v37  ;;  %v3390_v34 = vmul.f32 %v6161_v29, %v2878_v43  ;;  %v2832_v33 = vrot.slane %v2749_v7, 1 }
 0x3a6   : > { %vm2863_vm6 = vcmp.ge.f32.partialorder %v2855_v52, 0.0  ;;  %v2871_v8 = vmul.f32 0.2, %v2855_v52 }
 0x3a7   : > { %v3398_v45 = vadd.f32 %v3390_v34, %v3372_v44  ;;  %v2848_v49 = vsel %vm1181_vm2, %v2832_v33, %v2840_v59  ;;  %v4463_v9 = vpop.f32.mrb[52].mxu1 }
 0x3a8   : > { %v2879_v40 = vsel %vm2863_vm6, %v2855_v52, %v2871_v8  ;;  %v2856_v28 = vadd.f32 %v2848_v49, %v6145_v11  ;;  %v2841_v15 = vrot.slane %v4463_v9, 1  ;;  %v2759_v3 = vpop.f32.mrb[53].mxu1 }
 0x3a9   : > { %3406 = vst.msk [vmem:[%s6174_s29 + $0x18] sm:$0xff] %vm1232_vm1, %v3398_v45  ;;  %v3391_v36 = vmul.f32 %v6161_v29, %v2879_v40  ;;  %v2833_v41 = vrot.slane %v2759_v3, 1 }
 0x3aa   : > { %vm2864_vm7 = vcmp.ge.f32.partialorder %v2856_v28, 0.0  ;;  %v2872_v54 = vmul.f32 0.2, %v2856_v28 }
 0x3ab   : > { %v3399_v48 = vadd.f32 %v3391_v36, %v3373_v5  ;;  %v2849_v63 = vsel %vm1181_vm2, %v2833_v41, %v2841_v15  ;;  %v4466_v51 = vpop.f32.mrb[54].mxu1 }
 0x3ac   : > { %v2880_v11 = vsel %vm2864_vm7, %v2856_v28, %v2872_v54  ;;  %v2857_v26 = vadd.f32 %v2849_v63, %v6150_v16  ;;  %v2842_v56 = vrot.slane %v4466_v51, 1  ;;  %v2769_v58 = vpop.f32.mrb[55].mxu1 }
 0x3ad   : > { %3407 = vst.msk [vmem:[%s6174_s29 + $0x20] sm:$0xff] %vm1232_vm1, %v3399_v48  ;;  %v3392_v53 = vmul.f32 %v6161_v29, %v2880_v11  ;;  %v2834_v12 = vrot.slane %v2769_v58, 1 }
 0x3ae   : > { %vm2865_vm8 = vcmp.ge.f32.partialorder %v2857_v26, 0.0  ;;  %v2873_v27 = vmul.f32 0.2, %v2857_v26 }
 0x3af   : > { %v3400_v38 = vadd.f32 %v3392_v53, %v3374_v31  ;;  %v2850_v42 = vsel %vm1181_vm2, %v2834_v12, %v2842_v56 }
 0x3b0   : > { %v2881_v16 = vsel %vm2865_vm8, %v2857_v26, %v2873_v27  ;;  %v2858_v62 = vadd.f32 %v2850_v42, %v6155_v46 }
 0x3b1   : > { %3408 = vst.msk [vmem:[%s6174_s29 + $0x28] sm:$0xff] %vm1232_vm1, %v3400_v38  ;;  %v3393_v21 = vmul.f32 %v6161_v29, %v2881_v16 }
 0x3b2   : > { %vm2866_vm9 = vcmp.ge.f32.partialorder %v2858_v62, 0.0  ;;  %v2874_v1 = vmul.f32 0.2, %v2858_v62 }
 0x3b3   : > { %v3401_v32 = vadd.f32 %v3393_v21, %v3375_v20 }
 0x3b4   : > { %v2882_v2 = vsel %vm2866_vm9, %v2858_v62, %v2874_v1 }
 0x3b5   : > { %3409 = vst.msk [vmem:[%s6174_s29 + $0x30] sm:$0xff] %vm1232_vm1, %v3401_v32  ;;  %v3394_v46 = vmul.f32 %v6161_v29, %v2882_v2 }
 0x3b7   : > { %v3402_v50 = vadd.f32 %v3394_v46, %v3376_v23 }
 0x3b9   : > { %3410 = vst.msk [vmem:[%s6174_s29 + $0x38] sm:$0xff] %vm1232_vm1, %v3402_v50 }
 0x3ba   : > { %4866 = shalt.err (!%p4863_p0)
}
 0x3bb   : > { %s4867_s7 = scalar_lea.hbm %s6228_s15, 1024  ;;  %s4871_s16 = scalar_lea.hbm %s6288_s6, 2048 }
 0x3bc   : > { %p4868_p4 = scmp.ne.s32.totalorder %s6228_s15, %s4867_s7  ;;  %p4872_p12 = scmp.lt.u32.totalorder %s6228_s15, %s6288_s6 }
 0x3bd   : > { %p4873_p1 = scmp.lt.u32.totalorder %s4871_s16, %s4867_s7  ;;  %p4875_p8 = scmp.lt.u32.totalorder %s4867_s7, %s6228_s15 }
 0x3be   : > { %p4869_p13 = pnand %p4868_p4, %p5176_p5 }
 0x3bf   : > { %p4874_p11 = por %p4873_p1, %p4872_p12 }
 0x3c0   : > { %p4870_p2 = pneg %p4869_p13 }
 0x3c1   : > { %p4876_p6 = por %p4875_p8, %p4874_p11 }
 0x3c3   : > { %p4877_p10 = pnand %p4876_p6, %p4870_p2 }
 0x3c5   : > { %4880 = shalt.err (!%p4877_p10)
}
 0x3c6   : > { %s4959_s17 = smov 128  }
 0x3c7   : > { %4616 = dma.vmem_to_hbm [thread:$0]  (%p5176_p5), %s6230_s23, 1024, %s6228_s15, %s3412_s26, %s4959_s17, %s4959_s17, %s4952_s8  }
 0x3c8 PF: > { %s6310_s9 = sld [smem:[#allocation18_spill]]  ;;  %s6311_s22 = sld [smem:[#allocation19_spill]] }
 0x3c9   : > { %p6313_p7 = scmp.ge.s32.totalorder %s4943_s28, 2 }
 0x3ce   : > { %s3442_s20 = sand.u32 1, %s6310_s9   ;;  %p6312_p3 = scmp.ne.s32.totalorder %s6311_s22, 0 }
 0x3cf   : > { %s3443_s19 = scalar_lea.sflag [#allocation6], %s3442_s20 }
 0x3d0   : > { %p4636_p9 = pnand %p6313_p7, %p6312_p3 }
 0x3d2   : > { %4918 = dma.done.wait (!%p4636_p9), %s3443_s19, 1024  }
 0x3d3   : > { %4920 = vsyncadd (!%p4636_p9), %s3443_s19, 4294966272  ;;  %s26_s28 = sadd.s32 1, %s4943_s28   ;;  %s6314_s23 = smov %s4927_s24 }
 0x3d4   : > { %p23_p0 = scmp.ge.s32.totalorder %s26_s28, 4   ;;  %s6315_s24 = smov %s4931_s25 }
 0x3d5   : > { %s6316_s25 = smov %s5188_s11  ;;  %s6317_s26 = smov %s4939_s27 }
 0x3d6   : > { %s6318_s27 = smov %s6320_s5  ;;  %25 = sbr.rel (!%p23_p0) target bundleno = 11 (0xb), region = 125 }
 0x3dd   :  { %3448 = vsyncpa [#allocation5], 1 }
 0x3de   :  { %3450 = vsyncpa [#allocation5 + $0x1], 1 }
 0x3df   :  { %3451 = vsyncpa [#allocation8], 1 }
 0x3e0   :  { %3452 = vsyncpa [#allocation11], 1 }
 0x3e1   :  { %3453 = vsyncpa [#allocation6], 1 }
 0x3e2   :  { %3455 = vsyncpa [#allocation6 + $0x1], 1 }

</bundles_post_ra>
